<compile_context>
chip_gen: v5e
topology: v5e:2x2
jax: 0.10.0
libtpu: 0.0.40
codegen_flags: <defaults>
</compile_context>

<pallas_src>
import functools

import jax
import jax.numpy as jnp
from jax.experimental import pallas as pl
from jax.experimental.pallas import tpu as pltpu


# ----------------------------------------------------------------------------
# Pallas kernel: one batch-chunk per grid step, data in (C, nb*H*W) layout.
# ----------------------------------------------------------------------------
def meem_kernel(x_ref, masks_ref, w_in_ref, b_in_ref, w_mid_ref, b_mid_ref,
                w_ee_ref, b_ee_ref, w_out_ref, b_out_ref, o_ref, *, W):
    x = x_ref[...]                       # (Cin, L) float32, L = nb*H*W
    L = x.shape[1]
    hidden = w_in_ref.shape[0]
    num_mid = w_mid_ref.shape[0]         # width - 1 (static)

    # Precomputed per-image boundary masks (resident VMEM input, built once
    # in the wrapper; no per-step iota/compare VALU work).
    masks = masks_ref[...]
    m_not_first_col = masks[0:1, :]
    m_not_last_col = masks[1:2, :]
    m_not_first_row = masks[2:3, :]
    m_not_last_row = masks[3:4, :]

    def rollL(t, shift):
        # np.roll semantics on the flattened lane axis: result[p] = t[p - shift].
        return pltpu.roll(t, shift % L, axis=1)

    def pool_sum(t):
        # Un-normalized 3x3 box sum with zero padding (count_include_pad),
        # separable: 3 taps along W then 3 taps along H.  Rolls run on the
        # XLU; the masks reproduce both the zero padding and the per-image
        # boundaries of the batch-folded lane axis.
        sw = t + rollL(t, 1) * m_not_first_col + rollL(t, -1) * m_not_last_col
        return sw + rollL(sw, W) * m_not_first_row + rollL(sw, -W) * m_not_last_row

    def conv1x1(t, w, b):
        # t: (cin, L), w: (cout, cin), b: (cout, 1) -> (cout, L).
        # Tiny channel counts: VPU outer-product MACs, exact f32, no relayout.
        acc = w[:, 0:1] * t[0:1, :] + b
        for c in range(1, t.shape[0]):
            acc = acc + w[:, c:c + 1] * t[c:c + 1, :]
        return acc

    w_out = w_out_ref[...]               # (out_dim, hidden * width)

    def accum_out(y, t, base):
        # y += w_out[:, base:base+cin] @ t, accumulated with VPU MACs so the
        # concatenated feature map is never materialized.
        for c in range(t.shape[0]):
            y = y + w_out[:, base + c:base + c + 1] * t[c:c + 1, :]
        return y

    # in_conv: 1x1 conv + folded BN + sigmoid
    mid = jax.nn.sigmoid(conv1x1(x, w_in_ref[...], b_in_ref[...]))

    # out_conv accumulator: init directly from branch 0 + folded BN bias
    # (skips the zero-fill pass and the separate final bias add).
    y = w_out[:, 0:1] * mid[0:1, :] + b_out_ref[...]
    for c in range(1, hidden):
        y = y + w_out[:, c:c + 1] * mid[c:c + 1, :]

    for i in range(num_mid):
        # pool -> mid_conv.  The pool's 1/9 is folded into w_mid (wrapper),
        # so only the un-normalized 3x3 sum is needed here.
        mid = jax.nn.sigmoid(conv1x1(pool_sum(mid), w_mid_ref[i], b_mid_ref[i]))
        # EdgeEnhancer: edge = sigmoid(BN(conv1x1(mid - avgpool(mid)))); out = mid + edge
        edge = mid - pool_sum(mid) * (1.0 / 9.0)
        edge = jax.nn.sigmoid(conv1x1(edge, w_ee_ref[i], b_ee_ref[i]))
        y = accum_out(y, mid + edge, (i + 1) * hidden)

    # out_conv already accumulated (incl. folded BN bias); apply ReLU.
    # Output block is lane-dense (last dim multiple of 128 / full dim).
    o_ref[...] = jnp.maximum(y, 0.0).astype(o_ref.dtype)


# ----------------------------------------------------------------------------
# Wrapper
# ----------------------------------------------------------------------------
def _pick_batch_chunk(N, HW, Cin, out_dim, hidden, budget_bytes):
    # Approximate per-image per-step VMEM: in/out blocks (double buffered) +
    # a handful of hidden-channel temporaries + masks.
    per_img = 4 * HW * (2 * (Cin + out_dim) + 6 * hidden + 4)
    candidates = [nb for nb in range(1, N + 1)
                  if N % nb == 0 and (nb == N or (nb * HW) % 128 == 0)]
    fitting = [nb for nb in candidates if nb * per_img <= budget_bytes]
    return max(fitting) if fitting else min(candidates)


def meem_forward(x_nchw, params, *, vmem_budget_bytes=8 << 20):
    (w_in, b_in, w_mid, b_mid, w_ee, b_ee, w_out, b_out) = params
    N, Cin, H, W = x_nchw.shape
    hidden = w_in.shape[0]
    width = w_mid.shape[0] + 1
    out_dim = w_out.shape[0]
    HW = H * W

    # Fold the 1/9 of the pool feeding each mid_conv into its weights.
    w_mid_folded = w_mid * (1.0 / 9.0)

    # Channel-major with batch folded into lanes: (Cin, N*HW).
    x_cm = x_nchw.reshape(N, Cin, HW).transpose(1, 0, 2).reshape(Cin, N * HW)

    # How many whole images per grid step (keeps the per-step working set
    # bounded for v5e/v7x scoped VMEM while amortizing per-step overhead).
    nb = _pick_batch_chunk(N, HW, Cin, out_dim, hidden, vmem_budget_bytes)
    L = nb * HW
    n_steps = N // nb

    # Per-image boundary masks of the zero-padded 3x3 pool, built once here
    # (the pattern repeats every image, so one chunk's worth is resident).
    pos = jnp.arange(L, dtype=jnp.int32)[None, :]
    col = pos % W
    row_in_img = pos % HW
    masks = jnp.concatenate([
        (col != 0).astype(jnp.float32),
        (col != (W - 1)).astype(jnp.float32),
        (row_in_img >= W).astype(jnp.float32),
        (row_in_img < (HW - W)).astype(jnp.float32),
    ], axis=0)                                            # (4, L)

    def full_spec(arr):
        nd = arr.ndim
        return pl.BlockSpec(arr.shape, lambda g, _nd=nd: (0,) * _nd)

    # Advisory cost estimate so XLA schedules surrounding ops sensibly.
    flops_px = (2 * Cin * hidden
                + (width - 1) * (4 * hidden * hidden + 14 * hidden)
                + 2 * hidden * width * out_dim)
    trans_px = hidden + (width - 1) * 2 * hidden
    param_bytes = sum(int(p.size) * 4 for p in params)
    cost = pl.CostEstimate(
        flops=int(flops_px * N * HW),
        transcendentals=int(trans_px * N * HW),
        bytes_accessed=int((N * Cin * HW + N * out_dim * HW) * 4 + param_bytes),
    )

    kernel = functools.partial(meem_kernel, W=W)

    y_cm = pl.pallas_call(
        kernel,
        out_shape=jax.ShapeDtypeStruct((out_dim, N * HW), jnp.float32),
        grid=(n_steps,),
        in_specs=[
            pl.BlockSpec((Cin, L), lambda g: (0, g)),      # x chunk
            pl.BlockSpec((4, L), lambda g: (0, 0)),        # resident masks
            full_spec(w_in), full_spec(b_in),
            full_spec(w_mid_folded), full_spec(b_mid),
            full_spec(w_ee), full_spec(b_ee),
            full_spec(w_out), full_spec(b_out),
        ],
        out_specs=pl.BlockSpec((out_dim, L), lambda g: (0, g)),
        compiler_params=pltpu.CompilerParams(
            dimension_semantics=("parallel",),
            vmem_limit_bytes=32 * 1024 * 1024),
        cost_estimate=cost,
    )(x_cm, masks, w_in, b_in, w_mid_folded, b_mid, w_ee, b_ee, w_out, b_out)

    return (y_cm.reshape(out_dim, N, HW)
                .transpose(1, 0, 2)
                .reshape(N, out_dim, H, W))


# ----------------------------------------------------------------------------
# Deterministic parameter construction (conv weights + BN folded to scale/bias)
# Weights are stored channel-major: (Cout, Cin); biases as (Cout, 1).
# ----------------------------------------------------------------------------
def _folded_conv_bn(key, c_in, c_out, eps=1e-5):
    k0, k1, k2, k3, k4 = jax.random.split(key, 5)
    w = 0.5 * jax.random.normal(k0, (c_out, c_in), jnp.float32)
    gamma = 1.0 + 0.1 * jax.random.normal(k1, (c_out,), jnp.float32)
    beta = 0.1 * jax.random.normal(k2, (c_out,), jnp.float32)
    mean = 0.1 * jax.random.normal(k3, (c_out,), jnp.float32)
    var = 0.5 + jax.random.uniform(k4, (c_out,), jnp.float32)
    s = gamma / jnp.sqrt(var + eps)
    w_eff = w * s[:, None]
    b_eff = (beta - mean * s)[:, None]          # (c_out, 1)
    return w_eff, b_eff


def make_meem_params(key, in_dim, out_dim, width):
    hidden = in_dim // 2
    keys = jax.random.split(key, 2 + 2 * (width - 1))
    w_in, b_in = _folded_conv_bn(keys[0], in_dim, hidden)
    w_mid, b_mid, w_ee, b_ee = [], [], [], []
    for i in range(width - 1):
        wm, bm = _folded_conv_bn(keys[1 + 2 * i], hidden, hidden)
        we, be = _folded_conv_bn(keys[2 + 2 * i], hidden, hidden)
        w_mid.append(wm); b_mid.append(bm); w_ee.append(we); b_ee.append(be)
    w_out, b_out = _folded_conv_bn(keys[-1], hidden * width, out_dim)
    return (w_in, b_in,
            jnp.stack(w_mid), jnp.stack(b_mid),
            jnp.stack(w_ee), jnp.stack(b_ee),
            w_out, b_out)


# ----------------------------------------------------------------------------
# Pure-JAX reference (same eval-mode semantics, NCHW) for correctness checking
# ----------------------------------------------------------------------------
def meem_reference(x_nchw, params, width):
    (w_in, b_in, w_mid, b_mid, w_ee, b_ee, w_out, b_out) = params

    def conv(t, w, b):
        y = jnp.einsum('nchw,oc->nohw', t, w,
                       precision=jax.lax.Precision.HIGHEST)
        return y + b.reshape(1, -1, 1, 1)

    def pool(t):
        tp = jnp.pad(t, ((0, 0), (0, 0), (1, 1), (1, 1)))
        h, w_ = t.shape[2], t.shape[3]
        s = jnp.zeros_like(t)
        for dh in range(3):
            for dw in range(3):
                s = s + tp[:, :, dh:dh + h, dw:dw + w_]
        return s / 9.0

    mid = jax.nn.sigmoid(conv(x_nchw, w_in, b_in))
    outs = [mid]
    for i in range(width - 1):
        mid = pool(mid)
        mid = jax.nn.sigmoid(conv(mid, w_mid[i], b_mid[i]))
        edge = mid - pool(mid)
        edge = jax.nn.sigmoid(conv(edge, w_ee[i], b_ee[i]))
        outs.append(mid + edge)
    cat = jnp.concatenate(outs, axis=1)
    return jnp.maximum(conv(cat, w_out, b_out), 0.0)


if __name__ == "__main__":
    # Small shapes consistent with the module: N=2, in_dim=4, H=W=16,
    # width=4 -> hidden_dim=2, out_dim=4.
    N, in_dim, H, W = 2, 4, 16, 16
    out_dim, width = 4, 4

    key = jax.random.PRNGKey(0)
    kx, kp = jax.random.split(key)
    x_nchw = jax.random.normal(kx, (N, in_dim, H, W), jnp.float32)
    params = make_meem_params(kp, in_dim, out_dim, width)

    y = meem_forward(x_nchw, params)
    y = jax.block_until_ready(y)

    y_ref = meem_reference(x_nchw, params, width)
    assert y.shape == (N, out_dim, H, W)
    assert jnp.allclose(y, y_ref, rtol=1e-4, atol=1e-4), (
        float(jnp.max(jnp.abs(y - y_ref))))

    print("KERNEL_OK")
</pallas_src>

<mosaic_0001>
module attributes {stable_mosaic.version = 11 : i64} {
  func.func @meem_kernel(%arg0: i32, %arg1: memref<4x512xf32, #tpu.memory_space<vmem>>, %arg2: memref<4x512xf32, #tpu.memory_space<vmem>>, %arg3: memref<2x4xf32, #tpu.memory_space<vmem>>, %arg4: memref<2x1xf32, #tpu.memory_space<vmem>>, %arg5: memref<3x2x2xf32, #tpu.memory_space<vmem>>, %arg6: memref<3x2x1xf32, #tpu.memory_space<vmem>>, %arg7: memref<3x2x2xf32, #tpu.memory_space<vmem>>, %arg8: memref<3x2x1xf32, #tpu.memory_space<vmem>>, %arg9: memref<4x8xf32, #tpu.memory_space<vmem>>, %arg10: memref<4x1xf32, #tpu.memory_space<vmem>>, %arg11: memref<4x512xf32, #tpu.memory_space<vmem>>) attributes {dimension_semantics = [#tpu.dimension_semantics<parallel>], iteration_bounds = array<i64: 1>, scalar_prefetch = 0 : i64, scratch_operands = 0 : i64, tpu.core_type = #tpu.core_type<tc>, window_params = [{transform_indices = @transform_0, window_bounds = array<i64: 4, 512>}, {pipeline_mode = #tpu.pipeline_mode<synchronous>, transform_indices = @transform_1, window_bounds = array<i64: 4, 512>}, {pipeline_mode = #tpu.pipeline_mode<synchronous>, transform_indices = @transform_2, window_bounds = array<i64: 2, 4>}, {pipeline_mode = #tpu.pipeline_mode<synchronous>, transform_indices = @transform_3, window_bounds = array<i64: 2, 1>}, {pipeline_mode = #tpu.pipeline_mode<synchronous>, transform_indices = @transform_4, window_bounds = array<i64: 3, 2, 2>}, {pipeline_mode = #tpu.pipeline_mode<synchronous>, transform_indices = @transform_5, window_bounds = array<i64: 3, 2, 1>}, {pipeline_mode = #tpu.pipeline_mode<synchronous>, transform_indices = @transform_6, window_bounds = array<i64: 3, 2, 2>}, {pipeline_mode = #tpu.pipeline_mode<synchronous>, transform_indices = @transform_7, window_bounds = array<i64: 3, 2, 1>}, {pipeline_mode = #tpu.pipeline_mode<synchronous>, transform_indices = @transform_8, window_bounds = array<i64: 4, 8>}, {pipeline_mode = #tpu.pipeline_mode<synchronous>, transform_indices = @transform_9, window_bounds = array<i64: 4, 1>}, {transform_indices = @transform_10, window_bounds = array<i64: 4, 512>}]} {
    %c0 = arith.constant 0 : index
    %c0_0 = arith.constant 0 : index
    %0 = vector.load %arg1[%c0, %c0_0] : memref<4x512xf32, #tpu.memory_space<vmem>>, vector<4x512xf32>
    %c0_1 = arith.constant 0 : index
    %c0_2 = arith.constant 0 : index
    %1 = vector.load %arg2[%c0_1, %c0_2] : memref<4x512xf32, #tpu.memory_space<vmem>>, vector<4x512xf32>
    %2 = vector.extract_strided_slice %1 {offsets = [0, 0], sizes = [1, 512], strides = [1, 1]} : vector<4x512xf32> to vector<1x512xf32>
    %3 = vector.extract_strided_slice %1 {offsets = [1, 0], sizes = [1, 512], strides = [1, 1]} : vector<4x512xf32> to vector<1x512xf32>
    %4 = vector.extract_strided_slice %1 {offsets = [2, 0], sizes = [1, 512], strides = [1, 1]} : vector<4x512xf32> to vector<1x512xf32>
    %5 = vector.extract_strided_slice %1 {offsets = [3, 0], sizes = [1, 512], strides = [1, 1]} : vector<4x512xf32> to vector<1x512xf32>
    %c0_3 = arith.constant 0 : index
    %c0_4 = arith.constant 0 : index
    %6 = vector.load %arg9[%c0_3, %c0_4] : memref<4x8xf32, #tpu.memory_space<vmem>>, vector<4x8xf32>
    %c0_5 = arith.constant 0 : index
    %c0_6 = arith.constant 0 : index
    %7 = vector.load %arg3[%c0_5, %c0_6] : memref<2x4xf32, #tpu.memory_space<vmem>>, vector<2x4xf32>
    %c0_7 = arith.constant 0 : index
    %c0_8 = arith.constant 0 : index
    %8 = vector.load %arg4[%c0_7, %c0_8] : memref<2x1xf32, #tpu.memory_space<vmem>>, vector<2x1xf32>
    %9 = vector.extract_strided_slice %7 {offsets = [0, 0], sizes = [2, 1], strides = [1, 1]} : vector<2x4xf32> to vector<2x1xf32>
    %10 = vector.extract_strided_slice %0 {offsets = [0, 0], sizes = [1, 512], strides = [1, 1]} : vector<4x512xf32> to vector<1x512xf32>
    %11 = vector.broadcast %9 : vector<2x1xf32> to vector<2x512xf32>
    %12 = vector.broadcast %10 : vector<1x512xf32> to vector<2x512xf32>
    %13 = arith.mulf %11, %12 : vector<2x512xf32>
    %14 = vector.broadcast %8 : vector<2x1xf32> to vector<2x512xf32>
    %15 = arith.addf %13, %14 : vector<2x512xf32>
    %16 = vector.extract_strided_slice %7 {offsets = [0, 1], sizes = [2, 1], strides = [1, 1]} : vector<2x4xf32> to vector<2x1xf32>
    %17 = vector.extract_strided_slice %0 {offsets = [1, 0], sizes = [1, 512], strides = [1, 1]} : vector<4x512xf32> to vector<1x512xf32>
    %18 = vector.broadcast %16 : vector<2x1xf32> to vector<2x512xf32>
    %19 = vector.broadcast %17 : vector<1x512xf32> to vector<2x512xf32>
    %20 = arith.mulf %18, %19 : vector<2x512xf32>
    %21 = arith.addf %15, %20 : vector<2x512xf32>
    %22 = vector.extract_strided_slice %7 {offsets = [0, 2], sizes = [2, 1], strides = [1, 1]} : vector<2x4xf32> to vector<2x1xf32>
    %23 = vector.extract_strided_slice %0 {offsets = [2, 0], sizes = [1, 512], strides = [1, 1]} : vector<4x512xf32> to vector<1x512xf32>
    %24 = vector.broadcast %22 : vector<2x1xf32> to vector<2x512xf32>
    %25 = vector.broadcast %23 : vector<1x512xf32> to vector<2x512xf32>
    %26 = arith.mulf %24, %25 : vector<2x512xf32>
    %27 = arith.addf %21, %26 : vector<2x512xf32>
    %28 = vector.extract_strided_slice %7 {offsets = [0, 3], sizes = [2, 1], strides = [1, 1]} : vector<2x4xf32> to vector<2x1xf32>
    %29 = vector.extract_strided_slice %0 {offsets = [3, 0], sizes = [1, 512], strides = [1, 1]} : vector<4x512xf32> to vector<1x512xf32>
    %30 = vector.broadcast %28 : vector<2x1xf32> to vector<2x512xf32>
    %31 = vector.broadcast %29 : vector<1x512xf32> to vector<2x512xf32>
    %32 = arith.mulf %30, %31 : vector<2x512xf32>
    %33 = arith.addf %27, %32 : vector<2x512xf32>
    %34 = arith.negf %33 : vector<2x512xf32>
    %35 = math.exp %34 : vector<2x512xf32>
    %cst = arith.constant 1.000000e+00 : f32
    %36 = vector.broadcast %cst : f32 to vector<2x512xf32>
    %37 = arith.addf %36, %35 : vector<2x512xf32>
    %38 = arith.divf %36, %37 : vector<2x512xf32>
    %39 = vector.extract_strided_slice %6 {offsets = [0, 0], sizes = [4, 1], strides = [1, 1]} : vector<4x8xf32> to vector<4x1xf32>
    %40 = vector.extract_strided_slice %38 {offsets = [0, 0], sizes = [1, 512], strides = [1, 1]} : vector<2x512xf32> to vector<1x512xf32>
    %41 = vector.broadcast %39 : vector<4x1xf32> to vector<4x512xf32>
    %42 = vector.broadcast %40 : vector<1x512xf32> to vector<4x512xf32>
    %43 = arith.mulf %41, %42 : vector<4x512xf32>
    %c0_9 = arith.constant 0 : index
    %c0_10 = arith.constant 0 : index
    %44 = vector.load %arg10[%c0_9, %c0_10] : memref<4x1xf32, #tpu.memory_space<vmem>>, vector<4x1xf32>
    %45 = vector.broadcast %44 : vector<4x1xf32> to vector<4x512xf32>
    %46 = arith.addf %43, %45 : vector<4x512xf32>
    %47 = vector.extract_strided_slice %6 {offsets = [0, 1], sizes = [4, 1], strides = [1, 1]} : vector<4x8xf32> to vector<4x1xf32>
    %48 = vector.extract_strided_slice %38 {offsets = [1, 0], sizes = [1, 512], strides = [1, 1]} : vector<2x512xf32> to vector<1x512xf32>
    %49 = vector.broadcast %47 : vector<4x1xf32> to vector<4x512xf32>
    %50 = vector.broadcast %48 : vector<1x512xf32> to vector<4x512xf32>
    %51 = arith.mulf %49, %50 : vector<4x512xf32>
    %52 = arith.addf %46, %51 : vector<4x512xf32>
    %c1_i32 = arith.constant 1 : i32
    %53 = tpu.dynamic_rotate %38 by %c1_i32 dim 1 : vector<2x512xf32>, i32 -> vector<2x512xf32>
    %54 = vector.broadcast %2 : vector<1x512xf32> to vector<2x512xf32>
    %55 = arith.mulf %53, %54 : vector<2x512xf32>
    %56 = arith.addf %38, %55 : vector<2x512xf32>
    %c511_i32 = arith.constant 511 : i32
    %57 = tpu.dynamic_rotate %38 by %c511_i32 dim 1 : vector<2x512xf32>, i32 -> vector<2x512xf32>
    %58 = vector.broadcast %3 : vector<1x512xf32> to vector<2x512xf32>
    %59 = arith.mulf %57, %58 : vector<2x512xf32>
    %60 = arith.addf %56, %59 : vector<2x512xf32>
    %c16_i32 = arith.constant 16 : i32
    %61 = tpu.dynamic_rotate %60 by %c16_i32 dim 1 : vector<2x512xf32>, i32 -> vector<2x512xf32>
    %62 = vector.broadcast %4 : vector<1x512xf32> to vector<2x512xf32>
    %63 = arith.mulf %61, %62 : vector<2x512xf32>
    %64 = arith.addf %60, %63 : vector<2x512xf32>
    %c496_i32 = arith.constant 496 : i32
    %65 = tpu.dynamic_rotate %60 by %c496_i32 dim 1 : vector<2x512xf32>, i32 -> vector<2x512xf32>
    %66 = vector.broadcast %5 : vector<1x512xf32> to vector<2x512xf32>
    %67 = arith.mulf %65, %66 : vector<2x512xf32>
    %68 = arith.addf %64, %67 : vector<2x512xf32>
    %c0_11 = arith.constant 0 : index
    %c0_12 = arith.constant 0 : index
    %c0_13 = arith.constant 0 : index
    %69 = vector.load %arg5[%c0_11, %c0_12, %c0_13] : memref<3x2x2xf32, #tpu.memory_space<vmem>>, vector<1x2x2xf32>
    %70 = vector.shape_cast %69 : vector<1x2x2xf32> to vector<2x2xf32>
    %c0_14 = arith.constant 0 : index
    %c0_15 = arith.constant 0 : index
    %c0_16 = arith.constant 0 : index
    %71 = vector.load %arg6[%c0_14, %c0_15, %c0_16] : memref<3x2x1xf32, #tpu.memory_space<vmem>>, vector<1x2x1xf32>
    %72 = vector.shape_cast %71 : vector<1x2x1xf32> to vector<2x1xf32>
    %73 = vector.extract_strided_slice %70 {offsets = [0, 0], sizes = [2, 1], strides = [1, 1]} : vector<2x2xf32> to vector<2x1xf32>
    %74 = vector.extract_strided_slice %68 {offsets = [0, 0], sizes = [1, 512], strides = [1, 1]} : vector<2x512xf32> to vector<1x512xf32>
    %75 = vector.broadcast %73 : vector<2x1xf32> to vector<2x512xf32>
    %76 = vector.broadcast %74 : vector<1x512xf32> to vector<2x512xf32>
    %77 = arith.mulf %75, %76 : vector<2x512xf32>
    %78 = vector.broadcast %72 : vector<2x1xf32> to vector<2x512xf32>
    %79 = arith.addf %77, %78 : vector<2x512xf32>
    %80 = vector.extract_strided_slice %70 {offsets = [0, 1], sizes = [2, 1], strides = [1, 1]} : vector<2x2xf32> to vector<2x1xf32>
    %81 = vector.extract_strided_slice %68 {offsets = [1, 0], sizes = [1, 512], strides = [1, 1]} : vector<2x512xf32> to vector<1x512xf32>
    %82 = vector.broadcast %80 : vector<2x1xf32> to vector<2x512xf32>
    %83 = vector.broadcast %81 : vector<1x512xf32> to vector<2x512xf32>
    %84 = arith.mulf %82, %83 : vector<2x512xf32>
    %85 = arith.addf %79, %84 : vector<2x512xf32>
    %86 = arith.negf %85 : vector<2x512xf32>
    %87 = math.exp %86 : vector<2x512xf32>
    %cst_17 = arith.constant 1.000000e+00 : f32
    %88 = vector.broadcast %cst_17 : f32 to vector<2x512xf32>
    %89 = arith.addf %88, %87 : vector<2x512xf32>
    %90 = arith.divf %88, %89 : vector<2x512xf32>
    %c1_i32_18 = arith.constant 1 : i32
    %91 = tpu.dynamic_rotate %90 by %c1_i32_18 dim 1 : vector<2x512xf32>, i32 -> vector<2x512xf32>
    %92 = vector.broadcast %2 : vector<1x512xf32> to vector<2x512xf32>
    %93 = arith.mulf %91, %92 : vector<2x512xf32>
    %94 = arith.addf %90, %93 : vector<2x512xf32>
    %c511_i32_19 = arith.constant 511 : i32
    %95 = tpu.dynamic_rotate %90 by %c511_i32_19 dim 1 : vector<2x512xf32>, i32 -> vector<2x512xf32>
    %96 = vector.broadcast %3 : vector<1x512xf32> to vector<2x512xf32>
    %97 = arith.mulf %95, %96 : vector<2x512xf32>
    %98 = arith.addf %94, %97 : vector<2x512xf32>
    %c16_i32_20 = arith.constant 16 : i32
    %99 = tpu.dynamic_rotate %98 by %c16_i32_20 dim 1 : vector<2x512xf32>, i32 -> vector<2x512xf32>
    %100 = vector.broadcast %4 : vector<1x512xf32> to vector<2x512xf32>
    %101 = arith.mulf %99, %100 : vector<2x512xf32>
    %102 = arith.addf %98, %101 : vector<2x512xf32>
    %c496_i32_21 = arith.constant 496 : i32
    %103 = tpu.dynamic_rotate %98 by %c496_i32_21 dim 1 : vector<2x512xf32>, i32 -> vector<2x512xf32>
    %104 = vector.broadcast %5 : vector<1x512xf32> to vector<2x512xf32>
    %105 = arith.mulf %103, %104 : vector<2x512xf32>
    %106 = arith.addf %102, %105 : vector<2x512xf32>
    %cst_22 = arith.constant 0.111111112 : f32
    %107 = vector.broadcast %cst_22 : f32 to vector<2x512xf32>
    %108 = arith.mulf %106, %107 : vector<2x512xf32>
    %109 = arith.subf %90, %108 : vector<2x512xf32>
    %c0_23 = arith.constant 0 : index
    %c0_24 = arith.constant 0 : index
    %c0_25 = arith.constant 0 : index
    %110 = vector.load %arg7[%c0_23, %c0_24, %c0_25] : memref<3x2x2xf32, #tpu.memory_space<vmem>>, vector<1x2x2xf32>
    %111 = vector.shape_cast %110 : vector<1x2x2xf32> to vector<2x2xf32>
    %c0_26 = arith.constant 0 : index
    %c0_27 = arith.constant 0 : index
    %c0_28 = arith.constant 0 : index
    %112 = vector.load %arg8[%c0_26, %c0_27, %c0_28] : memref<3x2x1xf32, #tpu.memory_space<vmem>>, vector<1x2x1xf32>
    %113 = vector.shape_cast %112 : vector<1x2x1xf32> to vector<2x1xf32>
    %114 = vector.extract_strided_slice %111 {offsets = [0, 0], sizes = [2, 1], strides = [1, 1]} : vector<2x2xf32> to vector<2x1xf32>
    %115 = vector.extract_strided_slice %109 {offsets = [0, 0], sizes = [1, 512], strides = [1, 1]} : vector<2x512xf32> to vector<1x512xf32>
    %116 = vector.broadcast %114 : vector<2x1xf32> to vector<2x512xf32>
    %117 = vector.broadcast %115 : vector<1x512xf32> to vector<2x512xf32>
    %118 = arith.mulf %116, %117 : vector<2x512xf32>
    %119 = vector.broadcast %113 : vector<2x1xf32> to vector<2x512xf32>
    %120 = arith.addf %118, %119 : vector<2x512xf32>
    %121 = vector.extract_strided_slice %111 {offsets = [0, 1], sizes = [2, 1], strides = [1, 1]} : vector<2x2xf32> to vector<2x1xf32>
    %122 = vector.extract_strided_slice %109 {offsets = [1, 0], sizes = [1, 512], strides = [1, 1]} : vector<2x512xf32> to vector<1x512xf32>
    %123 = vector.broadcast %121 : vector<2x1xf32> to vector<2x512xf32>
    %124 = vector.broadcast %122 : vector<1x512xf32> to vector<2x512xf32>
    %125 = arith.mulf %123, %124 : vector<2x512xf32>
    %126 = arith.addf %120, %125 : vector<2x512xf32>
    %127 = arith.negf %126 : vector<2x512xf32>
    %128 = math.exp %127 : vector<2x512xf32>
    %cst_29 = arith.constant 1.000000e+00 : f32
    %129 = vector.broadcast %cst_29 : f32 to vector<2x512xf32>
    %130 = arith.addf %129, %128 : vector<2x512xf32>
    %131 = arith.divf %129, %130 : vector<2x512xf32>
    %132 = arith.addf %90, %131 : vector<2x512xf32>
    %133 = vector.extract_strided_slice %6 {offsets = [0, 2], sizes = [4, 1], strides = [1, 1]} : vector<4x8xf32> to vector<4x1xf32>
    %134 = vector.extract_strided_slice %132 {offsets = [0, 0], sizes = [1, 512], strides = [1, 1]} : vector<2x512xf32> to vector<1x512xf32>
    %135 = vector.broadcast %133 : vector<4x1xf32> to vector<4x512xf32>
    %136 = vector.broadcast %134 : vector<1x512xf32> to vector<4x512xf32>
    %137 = arith.mulf %135, %136 : vector<4x512xf32>
    %138 = arith.addf %52, %137 : vector<4x512xf32>
    %139 = vector.extract_strided_slice %6 {offsets = [0, 3], sizes = [4, 1], strides = [1, 1]} : vector<4x8xf32> to vector<4x1xf32>
    %140 = vector.extract_strided_slice %132 {offsets = [1, 0], sizes = [1, 512], strides = [1, 1]} : vector<2x512xf32> to vector<1x512xf32>
    %141 = vector.broadcast %139 : vector<4x1xf32> to vector<4x512xf32>
    %142 = vector.broadcast %140 : vector<1x512xf32> to vector<4x512xf32>
    %143 = arith.mulf %141, %142 : vector<4x512xf32>
    %144 = arith.addf %138, %143 : vector<4x512xf32>
    %c1_i32_30 = arith.constant 1 : i32
    %145 = tpu.dynamic_rotate %90 by %c1_i32_30 dim 1 : vector<2x512xf32>, i32 -> vector<2x512xf32>
    %146 = vector.broadcast %2 : vector<1x512xf32> to vector<2x512xf32>
    %147 = arith.mulf %145, %146 : vector<2x512xf32>
    %148 = arith.addf %90, %147 : vector<2x512xf32>
    %c511_i32_31 = arith.constant 511 : i32
    %149 = tpu.dynamic_rotate %90 by %c511_i32_31 dim 1 : vector<2x512xf32>, i32 -> vector<2x512xf32>
    %150 = vector.broadcast %3 : vector<1x512xf32> to vector<2x512xf32>
    %151 = arith.mulf %149, %150 : vector<2x512xf32>
    %152 = arith.addf %148, %151 : vector<2x512xf32>
    %c16_i32_32 = arith.constant 16 : i32
    %153 = tpu.dynamic_rotate %152 by %c16_i32_32 dim 1 : vector<2x512xf32>, i32 -> vector<2x512xf32>
    %154 = vector.broadcast %4 : vector<1x512xf32> to vector<2x512xf32>
    %155 = arith.mulf %153, %154 : vector<2x512xf32>
    %156 = arith.addf %152, %155 : vector<2x512xf32>
    %c496_i32_33 = arith.constant 496 : i32
    %157 = tpu.dynamic_rotate %152 by %c496_i32_33 dim 1 : vector<2x512xf32>, i32 -> vector<2x512xf32>
    %158 = vector.broadcast %5 : vector<1x512xf32> to vector<2x512xf32>
    %159 = arith.mulf %157, %158 : vector<2x512xf32>
    %160 = arith.addf %156, %159 : vector<2x512xf32>
    %c1 = arith.constant 1 : index
    %c0_34 = arith.constant 0 : index
    %c0_35 = arith.constant 0 : index
    %161 = vector.load %arg5[%c1, %c0_34, %c0_35] : memref<3x2x2xf32, #tpu.memory_space<vmem>>, vector<1x2x2xf32>
    %162 = vector.shape_cast %161 : vector<1x2x2xf32> to vector<2x2xf32>
    %c1_36 = arith.constant 1 : index
    %c0_37 = arith.constant 0 : index
    %c0_38 = arith.constant 0 : index
    %163 = vector.load %arg6[%c1_36, %c0_37, %c0_38] : memref<3x2x1xf32, #tpu.memory_space<vmem>>, vector<1x2x1xf32>
    %164 = vector.shape_cast %163 : vector<1x2x1xf32> to vector<2x1xf32>
    %165 = vector.extract_strided_slice %162 {offsets = [0, 0], sizes = [2, 1], strides = [1, 1]} : vector<2x2xf32> to vector<2x1xf32>
    %166 = vector.extract_strided_slice %160 {offsets = [0, 0], sizes = [1, 512], strides = [1, 1]} : vector<2x512xf32> to vector<1x512xf32>
    %167 = vector.broadcast %165 : vector<2x1xf32> to vector<2x512xf32>
    %168 = vector.broadcast %166 : vector<1x512xf32> to vector<2x512xf32>
    %169 = arith.mulf %167, %168 : vector<2x512xf32>
    %170 = vector.broadcast %164 : vector<2x1xf32> to vector<2x512xf32>
    %171 = arith.addf %169, %170 : vector<2x512xf32>
    %172 = vector.extract_strided_slice %162 {offsets = [0, 1], sizes = [2, 1], strides = [1, 1]} : vector<2x2xf32> to vector<2x1xf32>
    %173 = vector.extract_strided_slice %160 {offsets = [1, 0], sizes = [1, 512], strides = [1, 1]} : vector<2x512xf32> to vector<1x512xf32>
    %174 = vector.broadcast %172 : vector<2x1xf32> to vector<2x512xf32>
    %175 = vector.broadcast %173 : vector<1x512xf32> to vector<2x512xf32>
    %176 = arith.mulf %174, %175 : vector<2x512xf32>
    %177 = arith.addf %171, %176 : vector<2x512xf32>
    %178 = arith.negf %177 : vector<2x512xf32>
    %179 = math.exp %178 : vector<2x512xf32>
    %cst_39 = arith.constant 1.000000e+00 : f32
    %180 = vector.broadcast %cst_39 : f32 to vector<2x512xf32>
    %181 = arith.addf %180, %179 : vector<2x512xf32>
    %182 = arith.divf %180, %181 : vector<2x512xf32>
    %c1_i32_40 = arith.constant 1 : i32
    %183 = tpu.dynamic_rotate %182 by %c1_i32_40 dim 1 : vector<2x512xf32>, i32 -> vector<2x512xf32>
    %184 = vector.broadcast %2 : vector<1x512xf32> to vector<2x512xf32>
    %185 = arith.mulf %183, %184 : vector<2x512xf32>
    %186 = arith.addf %182, %185 : vector<2x512xf32>
    %c511_i32_41 = arith.constant 511 : i32
    %187 = tpu.dynamic_rotate %182 by %c511_i32_41 dim 1 : vector<2x512xf32>, i32 -> vector<2x512xf32>
    %188 = vector.broadcast %3 : vector<1x512xf32> to vector<2x512xf32>
    %189 = arith.mulf %187, %188 : vector<2x512xf32>
    %190 = arith.addf %186, %189 : vector<2x512xf32>
    %c16_i32_42 = arith.constant 16 : i32
    %191 = tpu.dynamic_rotate %190 by %c16_i32_42 dim 1 : vector<2x512xf32>, i32 -> vector<2x512xf32>
    %192 = vector.broadcast %4 : vector<1x512xf32> to vector<2x512xf32>
    %193 = arith.mulf %191, %192 : vector<2x512xf32>
    %194 = arith.addf %190, %193 : vector<2x512xf32>
    %c496_i32_43 = arith.constant 496 : i32
    %195 = tpu.dynamic_rotate %190 by %c496_i32_43 dim 1 : vector<2x512xf32>, i32 -> vector<2x512xf32>
    %196 = vector.broadcast %5 : vector<1x512xf32> to vector<2x512xf32>
    %197 = arith.mulf %195, %196 : vector<2x512xf32>
    %198 = arith.addf %194, %197 : vector<2x512xf32>
    %cst_44 = arith.constant 0.111111112 : f32
    %199 = vector.broadcast %cst_44 : f32 to vector<2x512xf32>
    %200 = arith.mulf %198, %199 : vector<2x512xf32>
    %201 = arith.subf %182, %200 : vector<2x512xf32>
    %c1_45 = arith.constant 1 : index
    %c0_46 = arith.constant 0 : index
    %c0_47 = arith.constant 0 : index
    %202 = vector.load %arg7[%c1_45, %c0_46, %c0_47] : memref<3x2x2xf32, #tpu.memory_space<vmem>>, vector<1x2x2xf32>
    %203 = vector.shape_cast %202 : vector<1x2x2xf32> to vector<2x2xf32>
    %c1_48 = arith.constant 1 : index
    %c0_49 = arith.constant 0 : index
    %c0_50 = arith.constant 0 : index
    %204 = vector.load %arg8[%c1_48, %c0_49, %c0_50] : memref<3x2x1xf32, #tpu.memory_space<vmem>>, vector<1x2x1xf32>
    %205 = vector.shape_cast %204 : vector<1x2x1xf32> to vector<2x1xf32>
    %206 = vector.extract_strided_slice %203 {offsets = [0, 0], sizes = [2, 1], strides = [1, 1]} : vector<2x2xf32> to vector<2x1xf32>
    %207 = vector.extract_strided_slice %201 {offsets = [0, 0], sizes = [1, 512], strides = [1, 1]} : vector<2x512xf32> to vector<1x512xf32>
    %208 = vector.broadcast %206 : vector<2x1xf32> to vector<2x512xf32>
    %209 = vector.broadcast %207 : vector<1x512xf32> to vector<2x512xf32>
    %210 = arith.mulf %208, %209 : vector<2x512xf32>
    %211 = vector.broadcast %205 : vector<2x1xf32> to vector<2x512xf32>
    %212 = arith.addf %210, %211 : vector<2x512xf32>
    %213 = vector.extract_strided_slice %203 {offsets = [0, 1], sizes = [2, 1], strides = [1, 1]} : vector<2x2xf32> to vector<2x1xf32>
    %214 = vector.extract_strided_slice %201 {offsets = [1, 0], sizes = [1, 512], strides = [1, 1]} : vector<2x512xf32> to vector<1x512xf32>
    %215 = vector.broadcast %213 : vector<2x1xf32> to vector<2x512xf32>
    %216 = vector.broadcast %214 : vector<1x512xf32> to vector<2x512xf32>
    %217 = arith.mulf %215, %216 : vector<2x512xf32>
    %218 = arith.addf %212, %217 : vector<2x512xf32>
    %219 = arith.negf %218 : vector<2x512xf32>
    %220 = math.exp %219 : vector<2x512xf32>
    %cst_51 = arith.constant 1.000000e+00 : f32
    %221 = vector.broadcast %cst_51 : f32 to vector<2x512xf32>
    %222 = arith.addf %221, %220 : vector<2x512xf32>
    %223 = arith.divf %221, %222 : vector<2x512xf32>
    %224 = arith.addf %182, %223 : vector<2x512xf32>
    %225 = vector.extract_strided_slice %6 {offsets = [0, 4], sizes = [4, 1], strides = [1, 1]} : vector<4x8xf32> to vector<4x1xf32>
    %226 = vector.extract_strided_slice %224 {offsets = [0, 0], sizes = [1, 512], strides = [1, 1]} : vector<2x512xf32> to vector<1x512xf32>
    %227 = vector.broadcast %225 : vector<4x1xf32> to vector<4x512xf32>
    %228 = vector.broadcast %226 : vector<1x512xf32> to vector<4x512xf32>
    %229 = arith.mulf %227, %228 : vector<4x512xf32>
    %230 = arith.addf %144, %229 : vector<4x512xf32>
    %231 = vector.extract_strided_slice %6 {offsets = [0, 5], sizes = [4, 1], strides = [1, 1]} : vector<4x8xf32> to vector<4x1xf32>
    %232 = vector.extract_strided_slice %224 {offsets = [1, 0], sizes = [1, 512], strides = [1, 1]} : vector<2x512xf32> to vector<1x512xf32>
    %233 = vector.broadcast %231 : vector<4x1xf32> to vector<4x512xf32>
    %234 = vector.broadcast %232 : vector<1x512xf32> to vector<4x512xf32>
    %235 = arith.mulf %233, %234 : vector<4x512xf32>
    %236 = arith.addf %230, %235 : vector<4x512xf32>
    %c1_i32_52 = arith.constant 1 : i32
    %237 = tpu.dynamic_rotate %182 by %c1_i32_52 dim 1 : vector<2x512xf32>, i32 -> vector<2x512xf32>
    %238 = vector.broadcast %2 : vector<1x512xf32> to vector<2x512xf32>
    %239 = arith.mulf %237, %238 : vector<2x512xf32>
    %240 = arith.addf %182, %239 : vector<2x512xf32>
    %c511_i32_53 = arith.constant 511 : i32
    %241 = tpu.dynamic_rotate %182 by %c511_i32_53 dim 1 : vector<2x512xf32>, i32 -> vector<2x512xf32>
    %242 = vector.broadcast %3 : vector<1x512xf32> to vector<2x512xf32>
    %243 = arith.mulf %241, %242 : vector<2x512xf32>
    %244 = arith.addf %240, %243 : vector<2x512xf32>
    %c16_i32_54 = arith.constant 16 : i32
    %245 = tpu.dynamic_rotate %244 by %c16_i32_54 dim 1 : vector<2x512xf32>, i32 -> vector<2x512xf32>
    %246 = vector.broadcast %4 : vector<1x512xf32> to vector<2x512xf32>
    %247 = arith.mulf %245, %246 : vector<2x512xf32>
    %248 = arith.addf %244, %247 : vector<2x512xf32>
    %c496_i32_55 = arith.constant 496 : i32
    %249 = tpu.dynamic_rotate %244 by %c496_i32_55 dim 1 : vector<2x512xf32>, i32 -> vector<2x512xf32>
    %250 = vector.broadcast %5 : vector<1x512xf32> to vector<2x512xf32>
    %251 = arith.mulf %249, %250 : vector<2x512xf32>
    %252 = arith.addf %248, %251 : vector<2x512xf32>
    %c2 = arith.constant 2 : index
    %c0_56 = arith.constant 0 : index
    %c0_57 = arith.constant 0 : index
    %253 = vector.load %arg5[%c2, %c0_56, %c0_57] : memref<3x2x2xf32, #tpu.memory_space<vmem>>, vector<1x2x2xf32>
    %254 = vector.shape_cast %253 : vector<1x2x2xf32> to vector<2x2xf32>
    %c2_58 = arith.constant 2 : index
    %c0_59 = arith.constant 0 : index
    %c0_60 = arith.constant 0 : index
    %255 = vector.load %arg6[%c2_58, %c0_59, %c0_60] : memref<3x2x1xf32, #tpu.memory_space<vmem>>, vector<1x2x1xf32>
    %256 = vector.shape_cast %255 : vector<1x2x1xf32> to vector<2x1xf32>
    %257 = vector.extract_strided_slice %254 {offsets = [0, 0], sizes = [2, 1], strides = [1, 1]} : vector<2x2xf32> to vector<2x1xf32>
    %258 = vector.extract_strided_slice %252 {offsets = [0, 0], sizes = [1, 512], strides = [1, 1]} : vector<2x512xf32> to vector<1x512xf32>
    %259 = vector.broadcast %257 : vector<2x1xf32> to vector<2x512xf32>
    %260 = vector.broadcast %258 : vector<1x512xf32> to vector<2x512xf32>
    %261 = arith.mulf %259, %260 : vector<2x512xf32>
    %262 = vector.broadcast %256 : vector<2x1xf32> to vector<2x512xf32>
    %263 = arith.addf %261, %262 : vector<2x512xf32>
    %264 = vector.extract_strided_slice %254 {offsets = [0, 1], sizes = [2, 1], strides = [1, 1]} : vector<2x2xf32> to vector<2x1xf32>
    %265 = vector.extract_strided_slice %252 {offsets = [1, 0], sizes = [1, 512], strides = [1, 1]} : vector<2x512xf32> to vector<1x512xf32>
    %266 = vector.broadcast %264 : vector<2x1xf32> to vector<2x512xf32>
    %267 = vector.broadcast %265 : vector<1x512xf32> to vector<2x512xf32>
    %268 = arith.mulf %266, %267 : vector<2x512xf32>
    %269 = arith.addf %263, %268 : vector<2x512xf32>
    %270 = arith.negf %269 : vector<2x512xf32>
    %271 = math.exp %270 : vector<2x512xf32>
    %cst_61 = arith.constant 1.000000e+00 : f32
    %272 = vector.broadcast %cst_61 : f32 to vector<2x512xf32>
    %273 = arith.addf %272, %271 : vector<2x512xf32>
    %274 = arith.divf %272, %273 : vector<2x512xf32>
    %c1_i32_62 = arith.constant 1 : i32
    %275 = tpu.dynamic_rotate %274 by %c1_i32_62 dim 1 : vector<2x512xf32>, i32 -> vector<2x512xf32>
    %276 = vector.broadcast %2 : vector<1x512xf32> to vector<2x512xf32>
    %277 = arith.mulf %275, %276 : vector<2x512xf32>
    %278 = arith.addf %274, %277 : vector<2x512xf32>
    %c511_i32_63 = arith.constant 511 : i32
    %279 = tpu.dynamic_rotate %274 by %c511_i32_63 dim 1 : vector<2x512xf32>, i32 -> vector<2x512xf32>
    %280 = vector.broadcast %3 : vector<1x512xf32> to vector<2x512xf32>
    %281 = arith.mulf %279, %280 : vector<2x512xf32>
    %282 = arith.addf %278, %281 : vector<2x512xf32>
    %c16_i32_64 = arith.constant 16 : i32
    %283 = tpu.dynamic_rotate %282 by %c16_i32_64 dim 1 : vector<2x512xf32>, i32 -> vector<2x512xf32>
    %284 = vector.broadcast %4 : vector<1x512xf32> to vector<2x512xf32>
    %285 = arith.mulf %283, %284 : vector<2x512xf32>
    %286 = arith.addf %282, %285 : vector<2x512xf32>
    %c496_i32_65 = arith.constant 496 : i32
    %287 = tpu.dynamic_rotate %282 by %c496_i32_65 dim 1 : vector<2x512xf32>, i32 -> vector<2x512xf32>
    %288 = vector.broadcast %5 : vector<1x512xf32> to vector<2x512xf32>
    %289 = arith.mulf %287, %288 : vector<2x512xf32>
    %290 = arith.addf %286, %289 : vector<2x512xf32>
    %cst_66 = arith.constant 0.111111112 : f32
    %291 = vector.broadcast %cst_66 : f32 to vector<2x512xf32>
    %292 = arith.mulf %290, %291 : vector<2x512xf32>
    %293 = arith.subf %274, %292 : vector<2x512xf32>
    %c2_67 = arith.constant 2 : index
    %c0_68 = arith.constant 0 : index
    %c0_69 = arith.constant 0 : index
    %294 = vector.load %arg7[%c2_67, %c0_68, %c0_69] : memref<3x2x2xf32, #tpu.memory_space<vmem>>, vector<1x2x2xf32>
    %295 = vector.shape_cast %294 : vector<1x2x2xf32> to vector<2x2xf32>
    %c2_70 = arith.constant 2 : index
    %c0_71 = arith.constant 0 : index
    %c0_72 = arith.constant 0 : index
    %296 = vector.load %arg8[%c2_70, %c0_71, %c0_72] : memref<3x2x1xf32, #tpu.memory_space<vmem>>, vector<1x2x1xf32>
    %297 = vector.shape_cast %296 : vector<1x2x1xf32> to vector<2x1xf32>
    %298 = vector.extract_strided_slice %295 {offsets = [0, 0], sizes = [2, 1], strides = [1, 1]} : vector<2x2xf32> to vector<2x1xf32>
    %299 = vector.extract_strided_slice %293 {offsets = [0, 0], sizes = [1, 512], strides = [1, 1]} : vector<2x512xf32> to vector<1x512xf32>
    %300 = vector.broadcast %298 : vector<2x1xf32> to vector<2x512xf32>
    %301 = vector.broadcast %299 : vector<1x512xf32> to vector<2x512xf32>
    %302 = arith.mulf %300, %301 : vector<2x512xf32>
    %303 = vector.broadcast %297 : vector<2x1xf32> to vector<2x512xf32>
    %304 = arith.addf %302, %303 : vector<2x512xf32>
    %305 = vector.extract_strided_slice %295 {offsets = [0, 1], sizes = [2, 1], strides = [1, 1]} : vector<2x2xf32> to vector<2x1xf32>
    %306 = vector.extract_strided_slice %293 {offsets = [1, 0], sizes = [1, 512], strides = [1, 1]} : vector<2x512xf32> to vector<1x512xf32>
    %307 = vector.broadcast %305 : vector<2x1xf32> to vector<2x512xf32>
    %308 = vector.broadcast %306 : vector<1x512xf32> to vector<2x512xf32>
    %309 = arith.mulf %307, %308 : vector<2x512xf32>
    %310 = arith.addf %304, %309 : vector<2x512xf32>
    %311 = arith.negf %310 : vector<2x512xf32>
    %312 = math.exp %311 : vector<2x512xf32>
    %cst_73 = arith.constant 1.000000e+00 : f32
    %313 = vector.broadcast %cst_73 : f32 to vector<2x512xf32>
    %314 = arith.addf %313, %312 : vector<2x512xf32>
    %315 = arith.divf %313, %314 : vector<2x512xf32>
    %316 = arith.addf %274, %315 : vector<2x512xf32>
    %317 = vector.extract_strided_slice %6 {offsets = [0, 6], sizes = [4, 1], strides = [1, 1]} : vector<4x8xf32> to vector<4x1xf32>
    %318 = vector.extract_strided_slice %316 {offsets = [0, 0], sizes = [1, 512], strides = [1, 1]} : vector<2x512xf32> to vector<1x512xf32>
    %319 = vector.broadcast %317 : vector<4x1xf32> to vector<4x512xf32>
    %320 = vector.broadcast %318 : vector<1x512xf32> to vector<4x512xf32>
    %321 = arith.mulf %319, %320 : vector<4x512xf32>
    %322 = arith.addf %236, %321 : vector<4x512xf32>
    %323 = vector.extract_strided_slice %6 {offsets = [0, 7], sizes = [4, 1], strides = [1, 1]} : vector<4x8xf32> to vector<4x1xf32>
    %324 = vector.extract_strided_slice %316 {offsets = [1, 0], sizes = [1, 512], strides = [1, 1]} : vector<2x512xf32> to vector<1x512xf32>
    %325 = vector.broadcast %323 : vector<4x1xf32> to vector<4x512xf32>
    %326 = vector.broadcast %324 : vector<1x512xf32> to vector<4x512xf32>
    %327 = arith.mulf %325, %326 : vector<4x512xf32>
    %328 = arith.addf %322, %327 : vector<4x512xf32>
    %cst_74 = arith.constant 0.000000e+00 : f32
    %329 = vector.broadcast %cst_74 : f32 to vector<4x512xf32>
    %330 = arith.maximumf %328, %329 : vector<4x512xf32>
    %c0_75 = arith.constant 0 : index
    %c0_76 = arith.constant 0 : index
    %331 = vector.load %arg11[%c0_75, %c0_76] : memref<4x512xf32, #tpu.memory_space<vmem>>, vector<4x512xf32>
    tpu.vector_store %arg11[%c0_75, %c0_76], %330 {strides = array<i32>} : memref<4x512xf32, #tpu.memory_space<vmem>>, vector<4x512xf32>,
    return
  }
  func.func @transform_0(%arg0: i32) -> (i32, i32) {
    %c0_i32 = arith.constant 0 : i32
    %c0_i32_0 = arith.constant 0 : i32
    return %c0_i32, %arg0 : i32, i32
  }
  func.func @transform_1(%arg0: i32) -> (i32, i32) {
    %c0_i32 = arith.constant 0 : i32
    %c0_i32_0 = arith.constant 0 : i32
    %c0_i32_1 = arith.constant 0 : i32
    return %c0_i32, %c0_i32_0 : i32, i32
  }
  func.func @transform_2(%arg0: i32) -> (i32, i32) {
    %c0_i32 = arith.constant 0 : i32
    %c0_i32_0 = arith.constant 0 : i32
    %c0_i32_1 = arith.constant 0 : i32
    return %c0_i32, %c0_i32_0 : i32, i32
  }
  func.func @transform_3(%arg0: i32) -> (i32, i32) {
    %c0_i32 = arith.constant 0 : i32
    %c0_i32_0 = arith.constant 0 : i32
    %c0_i32_1 = arith.constant 0 : i32
    return %c0_i32, %c0_i32_0 : i32, i32
  }
  func.func @transform_4(%arg0: i32) -> (i32, i32, i32) {
    %c0_i32 = arith.constant 0 : i32
    %c0_i32_0 = arith.constant 0 : i32
    %c0_i32_1 = arith.constant 0 : i32
    %c0_i32_2 = arith.constant 0 : i32
    return %c0_i32, %c0_i32_0, %c0_i32_1 : i32, i32, i32
  }
  func.func @transform_5(%arg0: i32) -> (i32, i32, i32) {
    %c0_i32 = arith.constant 0 : i32
    %c0_i32_0 = arith.constant 0 : i32
    %c0_i32_1 = arith.constant 0 : i32
    %c0_i32_2 = arith.constant 0 : i32
    return %c0_i32, %c0_i32_0, %c0_i32_1 : i32, i32, i32
  }
  func.func @transform_6(%arg0: i32) -> (i32, i32, i32) {
    %c0_i32 = arith.constant 0 : i32
    %c0_i32_0 = arith.constant 0 : i32
    %c0_i32_1 = arith.constant 0 : i32
    %c0_i32_2 = arith.constant 0 : i32
    return %c0_i32, %c0_i32_0, %c0_i32_1 : i32, i32, i32
  }
  func.func @transform_7(%arg0: i32) -> (i32, i32, i32) {
    %c0_i32 = arith.constant 0 : i32
    %c0_i32_0 = arith.constant 0 : i32
    %c0_i32_1 = arith.constant 0 : i32
    %c0_i32_2 = arith.constant 0 : i32
    return %c0_i32, %c0_i32_0, %c0_i32_1 : i32, i32, i32
  }
  func.func @transform_8(%arg0: i32) -> (i32, i32) {
    %c0_i32 = arith.constant 0 : i32
    %c0_i32_0 = arith.constant 0 : i32
    %c0_i32_1 = arith.constant 0 : i32
    return %c0_i32, %c0_i32_0 : i32, i32
  }
  func.func @transform_9(%arg0: i32) -> (i32, i32) {
    %c0_i32 = arith.constant 0 : i32
    %c0_i32_0 = arith.constant 0 : i32
    %c0_i32_1 = arith.constant 0 : i32
    return %c0_i32, %c0_i32_0 : i32, i32
  }
  func.func @transform_10(%arg0: i32) -> (i32, i32) {
    %c0_i32 = arith.constant 0 : i32
    %c0_i32_0 = arith.constant 0 : i32
    return %c0_i32, %arg0 : i32, i32
  }
}

</mosaic_0001>

<bundles_post_ra>
// kernel: tpu_custom_call.1
= control target key start
LH: loop header
LB: loop body
LE: loop exit
PB: predicated region body
PF: predicated region fallthrough
CT: control target
= control target key end

     0   :  { %15 = vsyncpa [#allocation3], 0  ;;  %s2758_s0 = inlined_call_operand.vmem [shape: f32[4,512], index: 0, kind: input, shape index: {}]   ;;  %s2759_s1 = inlined_call_operand.vmem [shape: f32[4,512], index: 1, kind: input, shape index: {}]   ;;  %s2760_s2 = inlined_call_operand.hbm [shape: f32[2,4], index: 2, kind: input, shape index: {}]   ;;  %s2761_s3 = inlined_call_operand.vmem [shape: f32[2,1], index: 3, kind: input, shape index: {}]   ;;  %s2762_s4 = inlined_call_operand.vmem [shape: f32[3,2,2], index: 4, kind: input, shape index: {}]   ;;  %s2763_s5 = inlined_call_operand.vmem [shape: f32[3,2,1], index: 5, kind: input, shape index: {}]   ;;  %s2764_s6 = inlined_call_operand.vmem [shape: f32[3,2,2], index: 6, kind: input, shape index: {}]   ;;  %s2765_s7 = inlined_call_operand.vmem [shape: f32[3,2,1], index: 7, kind: input, shape index: {}]   ;;  %s2766_s8 = inlined_call_operand.vmem [shape: f32[4,8], index: 8, kind: input, shape index: {}]   ;;  %s2767_s9 = inlined_call_operand.vmem [shape: f32[4,1], index: 9, kind: input, shape index: {}]   ;;  %s2768_s10 = inlined_call_operand.hbm [shape: f32[4,512], index: 10, kind: output, shape index: {}]  }
   0x1   :  { %16 = vsyncpa [#allocation4], 0  ;;  %s26_s15 = sshll.u32 %s2760_s2, 4  ;;  %s1757_s16 = smov [#allocation2]   ;;  %s27_s15 = int_to_ptr.hbm [resolvable:$true] %s26_s15 }
   0x2   :  { %s28_s17 = sshll.u32 %s1757_s16, 4  ;;  %s29_s17 = int_to_ptr.vmem [resolvable:$true] %s28_s17 }
   0x3   :  { %31 = dma.hbm_to_vmem [thread:$0]  %s27_s15, 32, %s29_s17, [#allocation3]  }
   0x4   :  { %1753 = dma.done.wait [#allocation3], 32  }
   0x5   :  { %1754 = vsyncadd [#allocation3], 4294967264  ;;  %v2772_v0 = vmov 0   ;;  %v2771_v1 = vmov 1   ;;  %v2769_v2 = vmov 3   ;;  %v2770_v5 = vmov 2  }
   0x6   :  { %1572 = vset.pattern.permute.xlu0 %v2772_v0  ;;  %1573 = vset.pattern.permute.xlu1 %v2771_v1  ;;  %v55_v3 = vld [vmem:[#allocation2] sm:$0x3]  ;;  %v51_v7 = vld [vmem:[%s2758_s0 + $0x8] sm:$0xff]  ;;  %s1765_s27 = smov 112   ;;  %s1512_s30 = sshll.u32 %s2768_s10, 4  ;;  %s1513_s30 = int_to_ptr.hbm [resolvable:$true] %s1512_s30 }
   0x7   :  { %1575 = vset.pattern.permute.xlu2 %v2769_v2  ;;  %59 = vperm.xlu0 %1572, %v55_v3   ;;  %v56_v4 = vld [vmem:[%s2761_s3] sm:$0x3]  ;;  %v143_v10 = vperm.slane %v51_v7, 3  ;;  %v144_v11 = vperm.slane %v51_v7, 7  ;;  %v66_v14 = vperm.slane %v51_v7, 0  ;;  %v67_v15 = vperm.slane %v51_v7, 4 }
   0x8   :  { %90 = vperm.xlu1 %1573, %v55_v3   ;;  %138 = vperm.xlu2 %1575, %v55_v3   ;;  %v50_v6 = vld [vmem:[%s2758_s0] sm:$0xff]  ;;  %v95_v20 = vperm.slane %v51_v7, 1  ;;  %v96_v21 = vperm.slane %v51_v7, 5  ;;  %v119_v24 = vperm.slane %v51_v7, 2  ;;  %v120_v25 = vperm.slane %v51_v7, 6  ;;  %s1762_s0 = smov 1  }
   0x9   :  { %v141_v8 = vperm.slane %v50_v6, 3  ;;  %v142_v9 = vperm.slane %v50_v6, 7  ;;  %v64_v12 = vperm.slane %v50_v6, 0  ;;  %v65_v13 = vperm.slane %v50_v6, 4  ;;  %s1763_s3 = smov 127  }
   0xa   :  { %v93_v18 = vperm.slane %v50_v6, 1  ;;  %v94_v19 = vperm.slane %v50_v6, 5  ;;  %v117_v22 = vperm.slane %v50_v6, 2  ;;  %v118_v23 = vperm.slane %v50_v6, 6 }
   0xb   :  { %v149_v26 = vperm.slane %v141_v8, 3  ;;  %v150_v27 = vperm.slane %v142_v9, 3  ;;  %v151_v28 = vperm.slane %v143_v10, 3  ;;  %v152_v29 = vperm.slane %v144_v11, 3 }
   0xc   :  { %v72_v30 = vperm.slane %v64_v12, 0  ;;  %v73_v31 = vperm.slane %v65_v13, 0  ;;  %v74_v32 = vperm.slane %v66_v14, 0  ;;  %v75_v33 = vperm.slane %v67_v15, 0 }
   0xd   :  { %v101_v35 = vperm.slane %v93_v18, 1  ;;  %v102_v36 = vperm.slane %v94_v19, 1  ;;  %v103_v37 = vperm.slane %v95_v20, 1  ;;  %v104_v38 = vperm.slane %v96_v21, 1 }
   0xe   :  { %v125_v39 = vperm.slane %v117_v22, 2  ;;  %v126_v40 = vperm.slane %v118_v23, 2  ;;  %v127_v41 = vperm.slane %v119_v24, 2  ;;  %v128_v42 = vperm.slane %v120_v25, 2 }
   0xf   :  { %82 = vperm.xlu0 %1572, %v56_v4  }
  0x10   :  { %1574 = vset.pattern.permute.xlu1 %v2770_v5  ;;  %1577 = vset.pattern.permute.xlu2 %v2771_v1 }
  0x11   :  { %114 = vperm.xlu1 %1574, %v55_v3  }
  0x19   :  { %1576 = vset.pattern.permute.xlu1 %v2772_v0 }
  0x62   :  { %v139_v34 = vpop.permute.xlu2 %138 }
  0x63   :  { %v153_v43 = vmul.f32 %v149_v26, %v139_v34  ;;  %v154_v44 = vmul.f32 %v150_v27, %v139_v34  ;;  %v155_v45 = vmul.f32 %v151_v28, %v139_v34  ;;  %v156_v46 = vmul.f32 %v152_v29, %v139_v34 }
  0x79   :  { %v60_v16 = vpop.permute.xlu0 %59 }
  0x7a   :  { %v91_v17 = vpop.permute.xlu1 %90  ;;  %v76_v47 = vmul.f32 %v72_v30, %v60_v16  ;;  %v77_v48 = vmul.f32 %v73_v31, %v60_v16  ;;  %v78_v49 = vmul.f32 %v74_v32, %v60_v16  ;;  %v79_v50 = vmul.f32 %v75_v33, %v60_v16 }
  0x7b   :  { %v105_v51 = vmul.f32 %v101_v35, %v91_v17  ;;  %v106_v52 = vmul.f32 %v102_v36, %v91_v17  ;;  %v107_v53 = vmul.f32 %v103_v37, %v91_v17  ;;  %v108_v54 = vmul.f32 %v104_v38, %v91_v17 }
  0x81   :  { %v83_v55 = vpop.permute.xlu0 %82 }
  0x82   :  { %v85_v56 = vadd.f32 %v83_v55, %v76_v47  ;;  %v86_v57 = vadd.f32 %v83_v55, %v77_v48  ;;  %v87_v58 = vadd.f32 %v83_v55, %v78_v49  ;;  %v88_v59 = vadd.f32 %v83_v55, %v79_v50 }
  0x83   :  { %v115_v60 = vpop.permute.xlu1 %114 }
  0x84   :  { %v129_v61 = vmul.f32 %v125_v39, %v115_v60  ;;  %v130_v62 = vmul.f32 %v126_v40, %v115_v60  ;;  %v131_v63 = vmul.f32 %v127_v41, %v115_v60  ;;  %v132_v3 = vmul.f32 %v128_v42, %v115_v60 }
  0x85   :  { %v109_v4 = vadd.f32 %v105_v51, %v85_v56  ;;  %v110_v6 = vadd.f32 %v106_v52, %v86_v57  ;;  %v111_v7 = vadd.f32 %v107_v53, %v87_v58  ;;  %v112_v8 = vadd.f32 %v108_v54, %v88_v59 }
  0x87   :  { %v133_v9 = vadd.f32 %v129_v61, %v109_v4  ;;  %v134_v10 = vadd.f32 %v130_v62, %v110_v6  ;;  %v135_v11 = vadd.f32 %v131_v63, %v111_v7  ;;  %v136_v12 = vadd.f32 %v132_v3, %v112_v8 }
  0x89   :  { %v157_v13 = vadd.f32 %v153_v43, %v133_v9  ;;  %v158_v14 = vadd.f32 %v154_v44, %v134_v10  ;;  %v159_v15 = vadd.f32 %v155_v45, %v135_v11  ;;  %v160_v16 = vadd.f32 %v156_v46, %v136_v12  ;;  %v1873_v11 = vld [vmem:[%s2759_s1] sm:$0xff] }
  0x8a   :  { %v284_v10 = vlaneseq }
  0x8b   :  { %v1522_v17 = vmul.f32 -1.442695, %v157_v13  ;;  %v1523_v18 = vmul.f32 -1.442695, %v158_v14  ;;  %v1524_v19 = vmul.f32 -1.442695, %v159_v15 }
  0x8c   :  { %v1525_v20 = vmul.f32 -1.442695, %v160_v16  ;;  %v1875_v12 = vand.u32 127, %v284_v10  ;;  %v293_v13 = vperm.slane %v1873_v11, 0  ;;  %v294_v15 = vperm.slane %v1873_v11, 4 }
  0x8d   :  { %1593 = vpow2.f32 %v1522_v17 }
  0x8e   :  { %1595 = vpow2.f32 %v1523_v18  ;;  %v1880_v18 = vperm.slane %v293_v13, 0  ;;  %v360_v13 = vperm.slane %v1873_v11, 6 }
  0x8f   :  { %1597 = vpow2.f32 %v1524_v19  ;;  %v1885_v19 = vld [vmem:[%s2759_s1 + $0x8] sm:$0xff]  ;;  %s1764_s1 = smov 16  }
  0x90   :  { %1599 = vpow2.f32 %v1525_v20  ;;  %v362_v10 = vperm.slane %v1885_v19, 6 }
  0x93   :  { %v1594_v21 = vpop.eup %1593 }
  0x94   :  { %v1596_v22 = vpop.eup %1595  ;;  %v173_v23 = vadd.f32 1.0, %v1594_v21  ;;  %v1889_v21 = vperm.slane %v294_v15, 0  ;;  %v361_v15 = vperm.slane %v1885_v19, 2 }
  0x95   :  { %v1598_v24 = vpop.eup %1597  ;;  %v174_v25 = vadd.f32 1.0, %v1596_v22  ;;  %v327_v22 = vperm.slane %v1873_v11, 5 }
  0x96   :  { %v1600_v26 = vpop.eup %1599  ;;  %v175_v27 = vadd.f32 1.0, %v1598_v24  ;;  %1601 = vrcp.f32 %v173_v23  ;;  %vm182_vm0 = vweird.f32 %v173_v23  ;;  %v186_v34 = vand.u32 2147483647, %v173_v23 }
  0x97   :  { %v176_v28 = vadd.f32 1.0, %v1600_v26  ;;  %1603 = vrcp.f32 %v174_v25  ;;  %vm197_vm1 = vweird.f32 %v174_v25  ;;  %v201_v37 = vand.u32 2147483647, %v174_v25 }
  0x98   :  { %1605 = vrcp.f32 %v175_v27  ;;  %v216_v39 = vand.u32 2147483647, %v175_v27  ;;  %v188_v41 = vand.u32 2147483648, %v173_v23  ;;  %v203_v44 = vand.u32 2147483648, %v174_v25 }
  0x99   :  { %1607 = vrcp.f32 %v176_v28  ;;  %v218_v46 = vand.u32 2147483648, %v175_v27  ;;  %vm212_vm4 = vweird.f32 %v175_v27  ;;  %vm202_vm6 = vcmp.eq.f32.partialorder %v201_v37, 8.507059e+37 }
  0x9a   :  { %v189_v52 = vor.u32 1.1754944e-38, %v188_v41  ;;  %v204_v55 = vor.u32 1.1754944e-38, %v203_v44  ;;  %vm187_vm9 = vcmp.eq.f32.partialorder %v186_v34, 8.507059e+37  ;;  %vm217_vm11 = vcmp.eq.f32.partialorder %v216_v39, 8.507059e+37 }
  0x9b   :  { %v219_v57 = vor.u32 1.1754944e-38, %v218_v46  ;;  %v233_v3 = vand.u32 2147483648, %v176_v28  ;;  %vm227_vm13 = vweird.f32 %v176_v28  ;;  %v231_v4 = vand.u32 2147483647, %v176_v28 }
  0x9c   :  { %v1602_v29 = vpop.eup %1601  ;;  %v295_v26 = vperm.slane %v1885_v19, 0  ;;  %v329_v37 = vperm.slane %v1885_v19, 5 }
  0x9d   :  { %v1604_v30 = vpop.eup %1603  ;;  %v178_v31 = vmul.f32 %v1602_v29, %v173_v23  ;;  %vm183_vm2 = vweird.f32 %v1602_v29  ;;  %v234_v7 = vor.u32 1.1754944e-38, %v233_v3  ;;  %vm232_vm15 = vcmp.eq.f32.partialorder %v231_v4, 8.507059e+37  ;;  %v412_v3 = vld [vmem:[%s2762_s4] sm:$0x3] }
  0x9e   :  { %v1606_v32 = vpop.eup %1605  ;;  %v193_v33 = vmul.f32 %v1604_v30, %v174_v25  ;;  %vm198_vm3 = vweird.f32 %v1604_v30  ;;  %vm184_vm7 = vmor %vm182_vm0, %vm183_vm2  ;;  %vm286_vm0 = vcmp.lt.s32.totalorder %v1875_v12, 1  ;;  %v326_v23 = vperm.slane %v1873_v11, 1  ;;  %v413_v4 = vld [vmem:[%s2763_s5] sm:$0x3] }
  0x9f   :  { %v1608_v35 = vpop.eup %1607  ;;  %v208_v36 = vmul.f32 %v1606_v32, %v175_v27  ;;  %v179_v38 = vsub.f32 1.0, %v178_v31  ;;  %vm213_vm5 = vweird.f32 %v1606_v32  ;;  %vm199_vm8 = vmor %vm197_vm1, %vm198_vm3  ;;  %v296_v25 = vperm.slane %v1885_v19, 4 }
  0xa0   :  { %v194_v40 = vsub.f32 1.0, %v193_v33  ;;  %v223_v42 = vmul.f32 %v1608_v35, %v176_v28  ;;  %vm214_vm10 = vmor %vm212_vm4, %vm213_vm5  ;;  %vm228_vm12 = vweird.f32 %v1608_v35  ;;  %vm321_vm1 = vcmp.lt.s32.totalorder %v1875_v12, 127 }
  0xa1   :  { %v209_v43 = vsub.f32 1.0, %v208_v36  ;;  %v180_v45 = vmul.f32 %v1602_v29, %v179_v38  ;;  %vm229_vm14 = vmor %vm227_vm13, %vm228_vm12  ;;  %v1904_v33 = vperm.slane %v296_v25, 0  ;;  %v1906_v34 = vperm.slane %v295_v26, 0 }
  0xa2   :  { %v195_v47 = vmul.f32 %v1604_v30, %v194_v40  ;;  %v224_v48 = vsub.f32 1.0, %v223_v42  ;;  %v328_v36 = vperm.slane %v1885_v19, 1  ;;  %vm387_vm2 = vcmp.lt.s32.totalorder %v1875_v12, 112 }
  0xa3   :  { %v210_v49 = vmul.f32 %v1606_v32, %v209_v43  ;;  %v181_v50 = vadd.f32 %v1602_v29, %v180_v45  ;;  %vm354_vm3 = vcmp.lt.s32.totalorder %v1875_v12, 16  ;;  %v392_v26 = vperm.slane %v1873_v11, 3 }
  0xa4   :  { %v196_v51 = vadd.f32 %v1604_v30, %v195_v47  ;;  %v225_v53 = vmul.f32 %v1608_v35, %v224_v48 }
  0xa5   :  { %v211_v54 = vadd.f32 %v1606_v32, %v210_v49  ;;  %v185_v56 = vsel %vm184_vm7, %v1602_v29, %v181_v50  ;;  %v1900_v29 = vperm.slane %v327_v22, 1  ;;  %v1928_v50 = vperm.slane %v328_v36, 1 }
  0xa6   :  { %v200_v58 = vsel %vm199_vm8, %v1604_v30, %v196_v51  ;;  %v1846_v59 = vsel %vm187_vm9, %v189_v52, %v185_v56  ;;  %v226_v62 = vadd.f32 %v1608_v35, %v225_v53  ;;  %v1902_v30 = vperm.slane %v326_v23, 1 }
  0xa7   :  { %v215_v60 = vsel %vm214_vm10, %v1606_v32, %v211_v54  ;;  %v1848_v61 = vsel %vm202_vm6, %v204_v55, %v200_v58  ;;  %276 = vrot.lane.b32.xlu2 %v1846_v59, %s1762_s0  ;;  %v1930_v51 = vperm.slane %v329_v37, 1  ;;  %v1969_v23 = vperm.slane %v360_v13, 2 }
  0xa8   :  { %v1852_v63 = vsel %vm217_vm11, %v219_v57, %v215_v60  ;;  %278 = vrot.lane.b32.xlu0 %v1848_v61, %s1762_s0  ;;  %v230_v6 = vsel %vm229_vm14, %v1608_v35, %v226_v62 }
  0xa9   :  { %280 = vrot.lane.b32.xlu1 %v1852_v63, %s1762_s0  ;;  %v1858_v8 = vsel %vm232_vm15, %v234_v7, %v230_v6 }
  0xaf   :  { %282 = vrot.lane.b32.xlu2 %v1858_v8, %s1762_s0 }
  0xb0   :  { %313 = vrot.lane.b32.xlu0 %v1846_v59, %s1763_s3 }
  0xb1   :  { %315 = vrot.lane.b32.xlu1 %v1848_v61, %s1763_s3 }
  0xb7   :  { %317 = vrot.lane.b32.xlu2 %v1852_v63, %s1763_s3 }
  0xb8   :  { %319 = vrot.lane.b32.xlu0 %v1858_v8, %s1763_s3 }
 0x101   :  { %v277_v9 = vpop.permute.xlu2 %276 }
 0x109   :  { %v283_v14 = vpop.permute.xlu2 %282 }
 0x10a   :  { %v290_v20 = vsel %vm286_vm0, %v283_v14, %v277_v9 }
 0x10b   :  { %v305_v27 = vmul.f32 %v1880_v18, %v290_v20  ;;  %v395_v20 = vperm.slane %v1885_v19, 7 }
 0x10d   :  { %v309_v38 = vadd.f32 %v305_v27, %v1846_v59 }
 0x111   :  { %v318_v32 = vpop.permute.xlu2 %317 }
 0x11a   :  { %v279_v16 = vpop.permute.xlu0 %278 }
 0x11b   :  { %v281_v17 = vpop.permute.xlu1 %280  ;;  %v289_v24 = vsel %vm286_vm0, %v277_v9, %v279_v16 }
 0x11c   :  { %v306_v28 = vmul.f32 %v1889_v21, %v289_v24  ;;  %v287_v39 = vsel %vm286_vm0, %v281_v17, %v283_v14  ;;  %v288_v42 = vsel %vm286_vm0, %v279_v16, %v281_v17  ;;  %v359_v14 = vperm.slane %v1873_v11, 2 }
 0x11d   :  { %v308_v48 = vmul.f32 %v1904_v33, %v287_v39  ;;  %v307_v49 = vmul.f32 %v1906_v34, %v288_v42  ;;  %v1964_v16 = vperm.slane %v362_v10, 2  ;;  %v1987_v39 = vperm.slane %v395_v20, 3 }
 0x11e   :  { %v310_v43 = vadd.f32 %v306_v28, %v1848_v61  ;;  %v1971_v24 = vperm.slane %v359_v14, 2  ;;  %v1992_v42 = vperm.slane %v392_v26, 3 }
 0x11f   :  { %v312_v55 = vadd.f32 %v308_v48, %v1858_v8  ;;  %v311_v56 = vadd.f32 %v307_v49, %v1852_v63  ;;  %2776 = vst [vmem:[#allocation8_spill] sm:$0xff] %v1964_v16 }
 0x120   :  { %2777 = vst [vmem:[#allocation9_spill] sm:$0xff] %v1987_v39 }
 0x122   :  { %v314_v31 = vpop.permute.xlu0 %313 }
 0x123   :  { %v316_v35 = vpop.permute.xlu1 %315 }
 0x124   :  { %v323_v40 = vsel %vm321_vm1, %v316_v35, %v318_v32  ;;  %v324_v41 = vsel %vm321_vm1, %v314_v31, %v316_v35  ;;  %v393_v35 = vperm.slane %v1873_v11, 7 }
 0x125   :  { %v339_v44 = vmul.f32 %v1900_v29, %v323_v40  ;;  %v338_v45 = vmul.f32 %v1902_v30, %v324_v41 }
 0x127   :  { %v1922_v46 = vadd.f32 %v338_v45, %v309_v38  ;;  %v1924_v47 = vadd.f32 %v339_v44, %v310_v43  ;;  %v1998_v44 = vperm.slane %v393_v35, 3 }
 0x129   :  { %346 = vrot.lane.b32.xlu1 %v1922_v46, %s1764_s1  ;;  %348 = vrot.lane.b32.xlu2 %v1924_v47, %s1764_s1 }
 0x12a   :  { %v320_v52 = vpop.permute.xlu0 %319 }
 0x12b   :  { %v322_v53 = vsel %vm321_vm1, %v318_v32, %v320_v52  ;;  %v325_v54 = vsel %vm321_vm1, %v320_v52, %v314_v31  ;;  %v1978_v31 = vperm.slane %v361_v15, 2  ;;  %v394_v32 = vperm.slane %v1885_v19, 3 }
 0x12c   :  { %v340_v57 = vmul.f32 %v1928_v50, %v322_v53  ;;  %v341_v58 = vmul.f32 %v1930_v51, %v325_v54 }
 0x12d   :  { %v1996_v43 = vperm.slane %v394_v32, 3 }
 0x12e   :  { %v345_v60 = vadd.f32 %v341_v58, %v312_v55  ;;  %v344_v62 = vadd.f32 %v340_v57, %v311_v56 }
 0x12f   :  { %2778 = vst [vmem:[#allocation10_spill] sm:$0xff] %v1996_v43 }
 0x130   :  { %350 = vrot.lane.b32.xlu0 %v344_v62, %s1764_s1 }
 0x131   :  { %352 = vrot.lane.b32.xlu1 %v345_v60, %s1764_s1  ;;  %379 = vrot.lane.b32.xlu2 %v1922_v46, %s1765_s27 }
 0x138   :  { %381 = vrot.lane.b32.xlu0 %v1924_v47, %s1765_s27 }
 0x139   :  { %385 = vrot.lane.b32.xlu2 %v345_v60, %s1765_s27  ;;  %383 = vrot.lane.b32.xlu1 %v344_v62, %s1765_s27 }
 0x140   :  { %416 = vperm.xlu0 %1572, %v412_v3  }
 0x141   :  { %429 = vperm.xlu1 %1576, %v413_v4   ;;  %437 = vperm.xlu2 %1577, %v412_v3  }
 0x148   :  { %1579 = vset.pattern.permute.xlu0 %v2771_v1 }
 0x149   :  { %1578 = vset.pattern.permute.xlu2 %v2772_v0 }
 0x183   :  { %v349_v6 = vpop.permute.xlu2 %348 }
 0x18b   :  { %v380_v7 = vpop.permute.xlu2 %379 }
 0x193   :  { %v386_v27 = vpop.permute.xlu2 %385 }
 0x194   :  { %v391_v40 = vsel %vm387_vm2, %v386_v27, %v380_v7 }
 0x195   :  { %v407_v49 = vmul.f32 %v1987_v39, %v391_v40 }
 0x19b   :  { %v347_v9 = vpop.permute.xlu1 %346 }
 0x19c   :  { %v357_v36 = vsel %vm354_vm3, %v347_v9, %v349_v6 }
 0x19d   :  { %v372_v19 = vmul.f32 %v1969_v23, %v357_v36 }
 0x19f   :  { %v376_v58 = vadd.f32 %v372_v19, %v1924_v47 }
 0x1a2   :  { %v351_v17 = vpop.permute.xlu0 %350 }
 0x1a3   :  { %v353_v22 = vpop.permute.xlu1 %352  ;;  %v356_v37 = vsel %vm354_vm3, %v349_v6, %v351_v17 }
 0x1a4   :  { %v355_v25 = vsel %vm354_vm3, %v351_v17, %v353_v22  ;;  %v358_v28 = vsel %vm354_vm3, %v353_v22, %v347_v9  ;;  %v373_v11 = vmul.f32 %v1978_v31, %v356_v37 }
 0x1a5   :  { %v374_v38 = vmul.f32 %v1964_v16, %v355_v25  ;;  %v371_v41 = vmul.f32 %v1971_v24, %v358_v28 }
 0x1a7   :  { %v378_v45 = vadd.f32 %v374_v38, %v345_v60  ;;  %v375_v54 = vadd.f32 %v371_v41, %v1922_v46  ;;  %v377_v60 = vadd.f32 %v373_v11, %v344_v62 }
 0x1a9   :  { %v411_v6 = vadd.f32 %v407_v49, %v378_v45 }
 0x1aa   :  { %v382_v48 = vpop.permute.xlu0 %381 }
 0x1ab   :  { %v384_v52 = vpop.permute.xlu1 %383  ;;  %v390_v53 = vsel %vm387_vm2, %v380_v7, %v382_v48  ;;  %v443_v22 = vperm.slane %v411_v6, 1  ;;  %v422_v25 = vperm.slane %v411_v6, 0 }
 0x1ac   :  { %v388_v55 = vsel %vm387_vm2, %v384_v52, %v386_v27  ;;  %v389_v56 = vsel %vm387_vm2, %v382_v48, %v384_v52  ;;  %v404_v57 = vmul.f32 %v1992_v42, %v390_v53  ;;  %v438_v27 = vpop.permute.xlu2 %437 }
 0x1ad   :  { %v406_v3 = vmul.f32 %v1996_v43, %v388_v55  ;;  %v405_v4 = vmul.f32 %v1998_v44, %v389_v56  ;;  %v447_v19 = vmul.f32 %v443_v22, %v438_v27 }
 0x1ae   :  { %v408_v9 = vadd.f32 %v404_v57, %v375_v54 }
 0x1af   :  { %v410_v7 = vadd.f32 %v406_v3, %v377_v60  ;;  %v409_v10 = vadd.f32 %v405_v4, %v376_v58 }
 0x1b0   :  { %v419_v46 = vperm.slane %v408_v9, 0  ;;  %v440_v15 = vperm.slane %v408_v9, 1 }
 0x1b1   :  { %v421_v13 = vperm.slane %v410_v7, 0  ;;  %v420_v14 = vperm.slane %v409_v10, 0  ;;  %v441_v17 = vperm.slane %v409_v10, 1  ;;  %v442_v20 = vperm.slane %v410_v7, 1 }
 0x1b2   :  { %v417_v26 = vpop.permute.xlu0 %416  ;;  %v444_v36 = vmul.f32 %v440_v15, %v438_v27 }
 0x1b3   :  { %v423_v47 = vmul.f32 %v419_v46, %v417_v26  ;;  %v424_v62 = vmul.f32 %v420_v14, %v417_v26  ;;  %v430_v28 = vpop.permute.xlu1 %429  ;;  %v425_v32 = vmul.f32 %v421_v13, %v417_v26  ;;  %v426_v35 = vmul.f32 %v422_v25, %v417_v26 }
 0x1b4   :  { %v445_v37 = vmul.f32 %v441_v17, %v438_v27  ;;  %v446_v41 = vmul.f32 %v442_v20, %v438_v27 }
 0x1b5   :  { %v432_v38 = vadd.f32 %v430_v28, %v423_v47  ;;  %v433_v40 = vadd.f32 %v430_v28, %v424_v62  ;;  %v434_v11 = vadd.f32 %v430_v28, %v425_v32  ;;  %v435_v45 = vadd.f32 %v430_v28, %v426_v35 }
 0x1b7   :  { %v448_v48 = vadd.f32 %v444_v36, %v432_v38  ;;  %v449_v49 = vadd.f32 %v445_v37, %v433_v40  ;;  %v450_v52 = vadd.f32 %v446_v41, %v434_v11  ;;  %v451_v53 = vadd.f32 %v447_v19, %v435_v45 }
 0x1b9   :  { %v1526_v54 = vmul.f32 -1.442695, %v448_v48  ;;  %v1527_v55 = vmul.f32 -1.442695, %v449_v49  ;;  %v1528_v56 = vmul.f32 -1.442695, %v450_v52 }
 0x1ba   :  { %v1529_v57 = vmul.f32 -1.442695, %v451_v53 }
 0x1bb   :  { %1609 = vpow2.f32 %v1526_v54 }
 0x1bc   :  { %1611 = vpow2.f32 %v1527_v55 }
 0x1bd   :  { %1613 = vpow2.f32 %v1528_v56 }
 0x1be   :  { %1615 = vpow2.f32 %v1529_v57 }
 0x1c1   :  { %v1610_v58 = vpop.eup %1609 }
 0x1c2   :  { %v1612_v60 = vpop.eup %1611  ;;  %v464_v3 = vadd.f32 1.0, %v1610_v58 }
 0x1c3   :  { %v1614_v4 = vpop.eup %1613  ;;  %v465_v6 = vadd.f32 1.0, %v1612_v60 }
 0x1c4   :  { %v1616_v9 = vpop.eup %1615  ;;  %v466_v7 = vadd.f32 1.0, %v1614_v4  ;;  %1617 = vrcp.f32 %v464_v3  ;;  %vm473_vm4 = vweird.f32 %v464_v3  ;;  %v477_v20 = vand.u32 2147483647, %v464_v3 }
 0x1c5   :  { %v467_v10 = vadd.f32 1.0, %v1616_v9  ;;  %1619 = vrcp.f32 %v465_v6  ;;  %vm488_vm5 = vweird.f32 %v465_v6  ;;  %v492_v26 = vand.u32 2147483647, %v465_v6 }
 0x1c6   :  { %1621 = vrcp.f32 %v466_v7  ;;  %v507_v47 = vand.u32 2147483647, %v466_v7  ;;  %v479_v28 = vand.u32 2147483648, %v464_v3  ;;  %v494_v36 = vand.u32 2147483648, %v465_v6 }
 0x1c7   :  { %1623 = vrcp.f32 %v467_v10  ;;  %v509_v38 = vand.u32 2147483648, %v466_v7  ;;  %vm503_vm8 = vweird.f32 %v466_v7  ;;  %vm493_vm10 = vcmp.eq.f32.partialorder %v492_v26, 8.507059e+37 }
 0x1c8   :  { %v480_v48 = vor.u32 1.1754944e-38, %v479_v28  ;;  %v495_v53 = vor.u32 1.1754944e-38, %v494_v36  ;;  %vm478_vm13 = vcmp.eq.f32.partialorder %v477_v20, 8.507059e+37  ;;  %vm508_vm15 = vcmp.eq.f32.partialorder %v507_v47, 8.507059e+37 }
 0x1c9   :  { %v510_v55 = vor.u32 1.1754944e-38, %v509_v38  ;;  %v522_v9 = vand.u32 2147483647, %v467_v10 }
 0x1ca   :  { %v1618_v46 = vpop.eup %1617 }
 0x1cb   :  { %v1620_v13 = vpop.eup %1619  ;;  %v469_v14 = vmul.f32 %v1618_v46, %v464_v3  ;;  %vm474_vm6 = vweird.f32 %v1618_v46 }
 0x1cc   :  { %v1622_v15 = vpop.eup %1621  ;;  %v484_v17 = vmul.f32 %v1620_v13, %v465_v6  ;;  %vm489_vm7 = vweird.f32 %v1620_v13  ;;  %vm475_vm11 = vmor %vm473_vm4, %vm474_vm6  ;;  %v524_v6 = vand.u32 2147483648, %v467_v10 }
 0x1cd   :  { %v1624_v22 = vpop.eup %1623  ;;  %v499_v25 = vmul.f32 %v1622_v15, %v466_v7  ;;  %v470_v27 = vsub.f32 1.0, %v469_v14  ;;  %vm504_vm9 = vweird.f32 %v1622_v15  ;;  %vm490_vm12 = vmor %vm488_vm5, %vm489_vm7  ;;  %vm518_vm5 = vweird.f32 %v467_v10 }
 0x1ce   :  { %v485_v62 = vsub.f32 1.0, %v484_v17  ;;  %v514_v32 = vmul.f32 %v1624_v22, %v467_v10  ;;  %vm505_vm14 = vmor %vm503_vm8, %vm504_vm9  ;;  %vm519_vm4 = vweird.f32 %v1624_v22  ;;  %vm523_vm7 = vcmp.eq.f32.partialorder %v522_v9, 8.507059e+37  ;;  %v1534_v9 = vld [vmem:[%s2762_s4 + $0x2] sm:$0x3] }
 0x1cf   :  { %v500_v35 = vsub.f32 1.0, %v499_v25  ;;  %v471_v37 = vmul.f32 %v1618_v46, %v470_v27  ;;  %vm520_vm6 = vmor %vm518_vm5, %vm519_vm4 }
 0x1d0   :  { %v486_v40 = vmul.f32 %v1620_v13, %v485_v62  ;;  %v515_v41 = vsub.f32 1.0, %v514_v32 }
 0x1d1   :  { %v501_v19 = vmul.f32 %v1622_v15, %v500_v35  ;;  %v472_v11 = vadd.f32 %v1618_v46, %v471_v37 }
 0x1d2   :  { %v487_v45 = vadd.f32 %v1620_v13, %v486_v40  ;;  %v516_v49 = vmul.f32 %v1624_v22, %v515_v41 }
 0x1d3   :  { %v502_v52 = vadd.f32 %v1622_v15, %v501_v19  ;;  %v476_v54 = vsel %vm475_vm11, %v1618_v46, %v472_v11  ;;  %v525_v46 = vor.u32 1.1754944e-38, %v524_v6 }
 0x1d4   :  { %v491_v56 = vsel %vm490_vm12, %v1620_v13, %v487_v45  ;;  %v2014_v57 = vsel %vm478_vm13, %v480_v48, %v476_v54  ;;  %v517_v3 = vadd.f32 %v1624_v22, %v516_v49 }
 0x1d5   :  { %v506_v58 = vsel %vm505_vm14, %v1622_v15, %v502_v52  ;;  %v2016_v60 = vsel %vm493_vm10, %v495_v53, %v491_v56  ;;  %528 = vrot.lane.b32.xlu0 %v2014_v57, %s1762_s0 }
 0x1d6   :  { %v2020_v4 = vsel %vm508_vm15, %v510_v55, %v506_v58  ;;  %530 = vrot.lane.b32.xlu1 %v2016_v60, %s1762_s0  ;;  %v521_v7 = vsel %vm520_vm6, %v1624_v22, %v517_v3 }
 0x1d7   :  { %532 = vrot.lane.b32.xlu2 %v2020_v4, %s1762_s0  ;;  %v2026_v13 = vsel %vm523_vm7, %v525_v46, %v521_v7  ;;  %v1535_v7 = vld [vmem:[%s2763_s5 + $0x2] sm:$0x3] }
 0x1dd   :  { %534 = vrot.lane.b32.xlu0 %v2026_v13, %s1762_s0 }
 0x1de   :  { %548 = vrot.lane.b32.xlu1 %v2014_v57, %s1763_s3 }
 0x1df   :  { %550 = vrot.lane.b32.xlu2 %v2016_v60, %s1763_s3 }
 0x1e5   :  { %552 = vrot.lane.b32.xlu0 %v2020_v4, %s1763_s3 }
 0x1e6   :  { %554 = vrot.lane.b32.xlu1 %v2026_v13, %s1763_s3 }
 0x231   :  { %v533_v10 = vpop.permute.xlu2 %532 }
 0x239   :  { %v551_v20 = vpop.permute.xlu2 %550 }
 0x247   :  { %v529_v14 = vpop.permute.xlu0 %528 }
 0x248   :  { %v531_v15 = vpop.permute.xlu1 %530 }
 0x249   :  { %v538_v47 = vsel %vm286_vm0, %v529_v14, %v531_v15  ;;  %v537_v62 = vsel %vm286_vm0, %v531_v15, %v533_v10 }
 0x24a   :  { %v541_v36 = vmul.f32 %v538_v47, %v1889_v21  ;;  %v542_v38 = vmul.f32 %v537_v62, %v1906_v34 }
 0x24c   :  { %v545_v45 = vadd.f32 %v541_v36, %v2016_v60  ;;  %v546_v53 = vadd.f32 %v542_v38, %v2020_v4 }
 0x24f   :  { %v535_v17 = vpop.permute.xlu0 %534 }
 0x250   :  { %v549_v22 = vpop.permute.xlu1 %548  ;;  %v539_v25 = vsel %vm286_vm0, %v535_v17, %v529_v14  ;;  %v536_v35 = vsel %vm286_vm0, %v533_v10, %v535_v17 }
 0x251   :  { %v558_v26 = vsel %vm321_vm1, %v549_v22, %v551_v20  ;;  %v540_v27 = vmul.f32 %v539_v25, %v1880_v18  ;;  %v543_v40 = vmul.f32 %v536_v35, %v1904_v33 }
 0x252   :  { %v560_v28 = vmul.f32 %v558_v26, %v1902_v30 }
 0x253   :  { %v544_v32 = vadd.f32 %v540_v27, %v2014_v57  ;;  %v547_v56 = vadd.f32 %v543_v40, %v2026_v13 }
 0x255   :  { %v564_v37 = vadd.f32 %v560_v28, %v544_v32 }
 0x257   :  { %568 = vrot.lane.b32.xlu2 %v564_v37, %s1764_s1  ;;  %v553_v41 = vpop.permute.xlu0 %552 }
 0x258   :  { %v555_v19 = vpop.permute.xlu1 %554  ;;  %v557_v11 = vsel %vm321_vm1, %v551_v20, %v553_v41 }
 0x259   :  { %v559_v48 = vsel %vm321_vm1, %v555_v19, %v549_v22  ;;  %v556_v49 = vsel %vm321_vm1, %v553_v41, %v555_v19  ;;  %v561_v52 = vmul.f32 %v557_v11, %v1900_v29 }
 0x25a   :  { %v563_v54 = vmul.f32 %v559_v48, %v1930_v51  ;;  %v562_v55 = vmul.f32 %v556_v49, %v1928_v50 }
 0x25b   :  { %v565_v58 = vadd.f32 %v561_v52, %v545_v45 }
 0x25c   :  { %v566_v3 = vadd.f32 %v562_v55, %v546_v53  ;;  %v567_v6 = vadd.f32 %v563_v54, %v547_v56 }
 0x25d   :  { %570 = vrot.lane.b32.xlu0 %v565_v58, %s1764_s1 }
 0x25e   :  { %572 = vrot.lane.b32.xlu1 %v566_v3, %s1764_s1 }
 0x25f   :  { %574 = vrot.lane.b32.xlu2 %v567_v6, %s1764_s1 }
 0x265   :  { %588 = vrot.lane.b32.xlu0 %v564_v37, %s1765_s27 }
 0x266   :  { %590 = vrot.lane.b32.xlu1 %v565_v58, %s1765_s27 }
 0x267   :  { %592 = vrot.lane.b32.xlu2 %v566_v3, %s1765_s27 }
 0x26d   :  { %594 = vrot.lane.b32.xlu0 %v567_v6, %s1765_s27 }
 0x26e   :  { %774 = vperm.xlu1 %1576, %v1534_v9  }
 0x26f   :  { %787 = vperm.xlu2 %1578, %v1535_v7  }
 0x275   :  { %795 = vperm.xlu0 %1579, %v1534_v9  }
 0x277   :  { %1581 = vset.pattern.permute.xlu2 %v2771_v1 }
 0x27d   :  { %1580 = vset.pattern.permute.xlu0 %v2772_v0 }
 0x2b1   :  { %v569_v46 = vpop.permute.xlu2 %568 }
 0x2b9   :  { %v575_v10 = vpop.permute.xlu2 %574 }
 0x2ba   :  { %v579_v17 = vsel %vm354_vm3, %v575_v10, %v569_v46 }
 0x2bb   :  { %v580_v22 = vmul.f32 %v579_v17, %v1971_v24 }
 0x2bd   :  { %v584_v62 = vadd.f32 %v580_v22, %v564_v37 }
 0x2c1   :  { %v593_v27 = vpop.permute.xlu2 %592 }
 0x2c9   :  { %v788_v17 = vpop.permute.xlu2 %787 }
 0x2cf   :  { %v571_v14 = vpop.permute.xlu0 %570 }
 0x2d0   :  { %v573_v15 = vpop.permute.xlu1 %572  ;;  %v578_v20 = vsel %vm354_vm3, %v569_v46, %v571_v14 }
 0x2d1   :  { %v581_v25 = vmul.f32 %v578_v20, %v1969_v23  ;;  %v576_v28 = vsel %vm354_vm3, %v573_v15, %v575_v10  ;;  %v577_v38 = vsel %vm354_vm3, %v571_v14, %v573_v15 }
 0x2d2   :  { %v582_v11 = vmul.f32 %v577_v38, %v1978_v31  ;;  %v583_v45 = vmul.f32 %v576_v28, %v1964_v16 }
 0x2d3   :  { %v585_v36 = vadd.f32 %v581_v25, %v565_v58 }
 0x2d4   :  { %v586_v56 = vadd.f32 %v582_v11, %v566_v3  ;;  %v587_v58 = vadd.f32 %v583_v45, %v567_v6 }
 0x2d7   :  { %v589_v26 = vpop.permute.xlu0 %588 }
 0x2d8   :  { %v591_v47 = vpop.permute.xlu1 %590 }
 0x2d9   :  { %v597_v32 = vsel %vm387_vm2, %v591_v47, %v593_v27  ;;  %v598_v35 = vsel %vm387_vm2, %v589_v26, %v591_v47 }
 0x2da   :  { %v600_v40 = vmul.f32 %v598_v35, %v1992_v42  ;;  %v601_v41 = vmul.f32 %v597_v32, %v1998_v44 }
 0x2dc   :  { %v2098_v19 = vadd.f32 %v600_v40, %v584_v62  ;;  %v2100_v37 = vadd.f32 %v601_v41, %v585_v36 }
 0x2de   :  { %v777_v49 = vperm.slane %v2098_v19, 0  ;;  %v778_v52 = vperm.slane %v2100_v37, 0  ;;  %v798_v25 = vperm.slane %v2098_v19, 1  ;;  %v799_v3 = vperm.slane %v2100_v37, 1 }
 0x2df   :  { %v595_v48 = vpop.permute.xlu0 %594 }
 0x2e0   :  { %v596_v53 = vsel %vm387_vm2, %v593_v27, %v595_v48  ;;  %v599_v54 = vsel %vm387_vm2, %v595_v48, %v589_v26  ;;  %v775_v55 = vpop.permute.xlu1 %774 }
 0x2e1   :  { %v602_v9 = vmul.f32 %v596_v53, %v1996_v43  ;;  %v603_v7 = vmul.f32 %v599_v54, %v1987_v39  ;;  %v781_v14 = vmul.f32 %v777_v49, %v775_v55  ;;  %v782_v15 = vmul.f32 %v778_v52, %v775_v55 }
 0x2e3   :  { %v2112_v46 = vadd.f32 %v602_v9, %v586_v56  ;;  %v2114_v10 = vadd.f32 %v603_v7, %v587_v58  ;;  %v790_v62 = vadd.f32 %v788_v17, %v781_v14  ;;  %v791_v28 = vadd.f32 %v788_v17, %v782_v15 }
 0x2e5   :  { %v779_v20 = vperm.slane %v2112_v46, 0  ;;  %v780_v22 = vperm.slane %v2114_v10, 0  ;;  %v800_v6 = vperm.slane %v2112_v46, 1  ;;  %v801_v26 = vperm.slane %v2114_v10, 1 }
 0x2e7   :  { %v783_v27 = vmul.f32 %v779_v20, %v775_v55  ;;  %v784_v47 = vmul.f32 %v780_v22, %v775_v55  ;;  %v796_v32 = vpop.permute.xlu0 %795 }
 0x2e8   :  { %v802_v35 = vmul.f32 %v798_v25, %v796_v32  ;;  %v803_v36 = vmul.f32 %v799_v3, %v796_v32  ;;  %v804_v38 = vmul.f32 %v800_v6, %v796_v32  ;;  %v805_v40 = vmul.f32 %v801_v26, %v796_v32 }
 0x2e9   :  { %v792_v41 = vadd.f32 %v788_v17, %v783_v27  ;;  %v793_v11 = vadd.f32 %v788_v17, %v784_v47 }
 0x2ea   :  { %v806_v45 = vadd.f32 %v802_v35, %v790_v62  ;;  %v807_v48 = vadd.f32 %v803_v36, %v791_v28 }
 0x2eb   :  { %v808_v49 = vadd.f32 %v804_v38, %v792_v41  ;;  %v809_v52 = vadd.f32 %v805_v40, %v793_v11 }
 0x2ec   :  { %v1536_v53 = vmul.f32 -1.442695, %v806_v45  ;;  %v1537_v54 = vmul.f32 -1.442695, %v807_v48 }
 0x2ed   :  { %v1538_v56 = vmul.f32 -1.442695, %v808_v49  ;;  %v1539_v58 = vmul.f32 -1.442695, %v809_v52 }
 0x2ee   :  { %1625 = vpow2.f32 %v1536_v53 }
 0x2ef   :  { %1627 = vpow2.f32 %v1537_v54 }
 0x2f0   :  { %1629 = vpow2.f32 %v1538_v56 }
 0x2f1   :  { %1631 = vpow2.f32 %v1539_v58 }
 0x2f4   :  { %v1626_v55 = vpop.eup %1625 }
 0x2f5   :  { %v1628_v9 = vpop.eup %1627  ;;  %v822_v7 = vadd.f32 1.0, %v1626_v55 }
 0x2f6   :  { %v1630_v14 = vpop.eup %1629  ;;  %v823_v15 = vadd.f32 1.0, %v1628_v9 }
 0x2f7   :  { %v1632_v20 = vpop.eup %1631  ;;  %v824_v22 = vadd.f32 1.0, %v1630_v14  ;;  %1633 = vrcp.f32 %v822_v7  ;;  %v835_v35 = vand.u32 2147483647, %v822_v7  ;;  %v837_v36 = vand.u32 2147483648, %v822_v7 }
 0x2f8   :  { %v825_v17 = vadd.f32 1.0, %v1632_v20  ;;  %1635 = vrcp.f32 %v823_v15  ;;  %v852_v40 = vand.u32 2147483648, %v823_v15  ;;  %v850_v48 = vand.u32 2147483647, %v823_v15 }
 0x2f9   :  { %1637 = vrcp.f32 %v824_v22  ;;  %vm831_vm10 = vweird.f32 %v822_v7  ;;  %vm846_vm11 = vweird.f32 %v823_v15  ;;  %v838_v56 = vor.u32 1.1754944e-38, %v837_v36 }
 0x2fa   :  { %1639 = vrcp.f32 %v825_v17  ;;  %v853_v55 = vor.u32 1.1754944e-38, %v852_v40  ;;  %vm836_vm14 = vcmp.eq.f32.partialorder %v835_v35, 8.507059e+37  ;;  %vm851_vm15 = vcmp.eq.f32.partialorder %v850_v48, 8.507059e+37 }
 0x2fb   :  { %vm861_vm6 = vweird.f32 %v824_v22  ;;  %vm876_vm7 = vweird.f32 %v825_v17 }
 0x2fd   :  { %v1634_v25 = vpop.eup %1633 }
 0x2fe   :  { %v1636_v3 = vpop.eup %1635  ;;  %v827_v6 = vmul.f32 %v1634_v25, %v822_v7  ;;  %vm832_vm8 = vweird.f32 %v1634_v25 }
 0x2ff   :  { %v1638_v26 = vpop.eup %1637  ;;  %v842_v27 = vmul.f32 %v1636_v3, %v823_v15  ;;  %vm847_vm9 = vweird.f32 %v1636_v3  ;;  %vm833_vm12 = vmor %vm831_vm10, %vm832_vm8 }
 0x300   :  { %v1640_v47 = vpop.eup %1639  ;;  %v828_v62 = vsub.f32 1.0, %v827_v6  ;;  %v857_v28 = vmul.f32 %v1638_v26, %v824_v22  ;;  %vm848_vm13 = vmor %vm846_vm11, %vm847_vm9  ;;  %vm862_vm4 = vweird.f32 %v1638_v26 }
 0x301   :  { %v843_v32 = vsub.f32 1.0, %v842_v27  ;;  %v872_v38 = vmul.f32 %v1640_v47, %v825_v17  ;;  %vm877_vm5 = vweird.f32 %v1640_v47  ;;  %v880_v27 = vand.u32 2147483647, %v825_v17  ;;  %vm863_vm8 = vmor %vm861_vm6, %vm862_vm4 }
 0x302   :  { %v829_v41 = vmul.f32 %v1634_v25, %v828_v62  ;;  %v858_v11 = vsub.f32 1.0, %v857_v28  ;;  %v865_v62 = vand.u32 2147483647, %v824_v22  ;;  %vm878_vm9 = vmor %vm876_vm7, %vm877_vm5 }
 0x303   :  { %v844_v45 = vmul.f32 %v1636_v3, %v843_v32  ;;  %v873_v49 = vsub.f32 1.0, %v872_v38  ;;  %vm881_vm10 = vcmp.eq.f32.partialorder %v880_v27, 8.507059e+37 }
 0x304   :  { %v830_v52 = vadd.f32 %v1634_v25, %v829_v41  ;;  %v859_v53 = vmul.f32 %v1638_v26, %v858_v11  ;;  %vm866_vm11 = vcmp.eq.f32.partialorder %v865_v62, 8.507059e+37 }
 0x305   :  { %v845_v54 = vadd.f32 %v1636_v3, %v844_v45  ;;  %v874_v58 = vmul.f32 %v1640_v47, %v873_v49 }
 0x306   :  { %v834_v9 = vsel %vm833_vm12, %v1634_v25, %v830_v52  ;;  %v860_v15 = vadd.f32 %v1638_v26, %v859_v53  ;;  %v882_v25 = vand.u32 2147483648, %v825_v17 }
 0x307   :  { %v849_v14 = vsel %vm848_vm13, %v1636_v3, %v845_v54  ;;  %v2122_v20 = vsel %vm836_vm14, %v838_v56, %v834_v9  ;;  %v875_v7 = vadd.f32 %v1640_v47, %v874_v58  ;;  %v867_v3 = vand.u32 2147483648, %v824_v22 }
 0x308   :  { %v2124_v6 = vsel %vm851_vm15, %v853_v55, %v849_v14  ;;  %906 = vrot.lane.b32.xlu0 %v2122_v20, %s1763_s3  ;;  %886 = vrot.lane.b32.xlu1 %v2122_v20, %s1762_s0  ;;  %v864_v32 = vsel %vm863_vm8, %v1638_v26, %v860_v15  ;;  %v883_v35 = vor.u32 1.1754944e-38, %v882_v25 }
 0x309   :  { %888 = vrot.lane.b32.xlu2 %v2124_v6, %s1762_s0  ;;  %v879_v28 = vsel %vm878_vm9, %v1640_v47, %v875_v7  ;;  %v868_v36 = vor.u32 1.1754944e-38, %v867_v3 }
 0x30a   :  { %v2132_v38 = vsel %vm881_vm10, %v883_v35, %v879_v28 }
 0x30b   :  { %v2134_v40 = vsel %vm866_vm11, %v868_v36, %v864_v32 }
 0x310   :  { %912 = vrot.lane.b32.xlu0 %v2132_v38, %s1763_s3  ;;  %890 = vrot.lane.b32.xlu1 %v2134_v40, %s1762_s0 }
 0x311   :  { %892 = vrot.lane.b32.xlu2 %v2132_v38, %s1762_s0 }
 0x318   :  { %908 = vrot.lane.b32.xlu1 %v2124_v6, %s1763_s3 }
 0x319   :  { %910 = vrot.lane.b32.xlu2 %v2134_v40, %s1763_s3 }
 0x363   :  { %v889_v22 = vpop.permute.xlu2 %888 }
 0x36b   :  { %v893_v17 = vpop.permute.xlu2 %892 }
 0x373   :  { %v911_v41 = vpop.permute.xlu2 %910 }
 0x37a   :  { %v907_v26 = vpop.permute.xlu0 %906  ;;  %v887_v47 = vpop.permute.xlu1 %886 }
 0x37b   :  { %v896_v53 = vsel %vm286_vm0, %v887_v47, %v889_v22  ;;  %v897_v54 = vsel %vm286_vm0, %v893_v17, %v887_v47 }
 0x37c   :  { %v898_v55 = vmul.f32 %v897_v54, %v1880_v18  ;;  %v899_v9 = vmul.f32 %v896_v53, %v1889_v21 }
 0x37e   :  { %v902_v27 = vadd.f32 %v898_v55, %v2122_v20  ;;  %v903_v62 = vadd.f32 %v899_v9, %v2124_v6 }
 0x382   :  { %v913_v11 = vpop.permute.xlu0 %912  ;;  %v891_v45 = vpop.permute.xlu1 %890 }
 0x383   :  { %v914_v48 = vsel %vm321_vm1, %v911_v41, %v913_v11  ;;  %v895_v49 = vsel %vm286_vm0, %v889_v22, %v891_v45  ;;  %v894_v15 = vsel %vm286_vm0, %v891_v45, %v893_v17  ;;  %v917_v17 = vsel %vm321_vm1, %v913_v11, %v907_v26  ;;  %v2191_v11 = vld [vmem:[%s2766_s8] sm:$0xf] }
 0x384   :  { %v900_v52 = vmul.f32 %v895_v49, %v1906_v34  ;;  %v920_v56 = vmul.f32 %v914_v48, %v1928_v50  ;;  %v901_v35 = vmul.f32 %v894_v15, %v1904_v33  ;;  %v1546_v48 = vld [vmem:[%s2762_s4 + $0x4] sm:$0x3]  ;;  %v250_v49 = vld [vmem:[%s2767_s9] sm:$0xf] }
 0x386   :  { %v904_v58 = vadd.f32 %v900_v52, %v2134_v40  ;;  %v905_v47 = vadd.f32 %v901_v35, %v2132_v38 }
 0x388   :  { %v924_v14 = vadd.f32 %v920_v56, %v904_v58 }
 0x38a   :  { %930 = vrot.lane.b32.xlu0 %v924_v14, %s1764_s1  ;;  %v909_v7 = vpop.permute.xlu1 %908 }
 0x38b   :  { %v915_v25 = vsel %vm321_vm1, %v909_v7, %v911_v41  ;;  %v916_v3 = vsel %vm321_vm1, %v907_v26, %v909_v7  ;;  %v921_v41 = vmul.f32 %v917_v17, %v1930_v51  ;;  %v1547_v26 = vld [vmem:[%s2763_s5 + $0x4] sm:$0x3] }
 0x38c   :  { %v918_v28 = vmul.f32 %v916_v3, %v1902_v30  ;;  %v919_v32 = vmul.f32 %v915_v25, %v1900_v29 }
 0x38d   :  { %v925_v45 = vadd.f32 %v921_v41, %v905_v47 }
 0x38e   :  { %v922_v36 = vadd.f32 %v918_v28, %v902_v27  ;;  %v923_v22 = vadd.f32 %v919_v32, %v903_v62 }
 0x390   :  { %926 = vrot.lane.b32.xlu1 %v922_v36, %s1764_s1  ;;  %928 = vrot.lane.b32.xlu2 %v923_v22, %s1764_s1 }
 0x392   :  { %948 = vrot.lane.b32.xlu0 %v923_v22, %s1765_s27 }
 0x398   :  { %932 = vrot.lane.b32.xlu1 %v925_v45, %s1764_s1  ;;  %946 = vrot.lane.b32.xlu2 %v922_v36, %s1765_s27 }
 0x39a   :  { %1134 = vperm.xlu0 %1580, %v1546_v48  }
 0x3a0   :  { %950 = vrot.lane.b32.xlu1 %v924_v14, %s1765_s27  ;;  %952 = vrot.lane.b32.xlu2 %v925_v45, %s1765_s27 }
 0x3a8   :  { %1147 = vperm.xlu1 %1576, %v1547_v26   ;;  %1155 = vperm.xlu2 %1581, %v1546_v48  }
 0x3b0   :  { %239 = vperm.xlu1 %1576, %v2191_v11   ;;  %1582 = vset.pattern.permute.xlu2 %v2772_v0 }
 0x3b1   :  { %253 = vperm.xlu2 %1582, %v250_v49  }
 0x3b9   :  { %1583 = vset.pattern.permute.xlu2 %v2771_v1 }
 0x3ea   :  { %v929_v52 = vpop.permute.xlu2 %928 }
 0x3f2   :  { %v947_v53 = vpop.permute.xlu2 %946 }
 0x3fa   :  { %v953_v58 = vpop.permute.xlu2 %952 }
 0x3fb   :  { %v957_v25 = vsel %vm387_vm2, %v953_v58, %v947_v53 }
 0x3fc   :  { %v931_v54 = vpop.permute.xlu0 %930  ;;  %v961_v47 = vmul.f32 %v957_v25, %v1987_v39 }
 0x3fd   :  { %v935_v28 = vsel %vm354_vm3, %v929_v52, %v931_v54 }
 0x3fe   :  { %v940_v48 = vmul.f32 %v935_v28, %v1978_v31 }
 0x402   :  { %v927_v56 = vpop.permute.xlu1 %926 }
 0x403   :  { %v936_v32 = vsel %vm354_vm3, %v927_v56, %v929_v52 }
 0x404   :  { %v949_v55 = vpop.permute.xlu0 %948  ;;  %v939_v26 = vmul.f32 %v936_v32, %v1969_v23 }
 0x405   :  { %v956_v3 = vsel %vm387_vm2, %v947_v53, %v949_v55 }
 0x406   :  { %v958_v41 = vmul.f32 %v956_v3, %v1992_v42  ;;  %v943_v52 = vadd.f32 %v939_v26, %v923_v22 }
 0x40a   :  { %v933_v9 = vpop.permute.xlu1 %932 }
 0x40b   :  { %v934_v7 = vsel %vm354_vm3, %v931_v54, %v933_v9  ;;  %v937_v15 = vsel %vm354_vm3, %v933_v9, %v927_v56 }
 0x40c   :  { %v938_v27 = vmul.f32 %v937_v15, %v1971_v24  ;;  %v941_v62 = vmul.f32 %v934_v7, %v1964_v16 }
 0x40e   :  { %v942_v35 = vadd.f32 %v938_v27, %v922_v36  ;;  %v945_v17 = vadd.f32 %v941_v62, %v925_v45  ;;  %v944_v45 = vadd.f32 %v940_v48, %v924_v14  ;;  %v1135_v62 = vpop.permute.xlu0 %1134 }
 0x410   :  { %v2217_v49 = vadd.f32 %v958_v41, %v942_v35  ;;  %v2219_v53 = vadd.f32 %v961_v47, %v945_v17 }
 0x412   :  { %v951_v9 = vpop.permute.xlu1 %950  ;;  %v1137_v15 = vperm.slane %v2217_v49, 0  ;;  %v1140_v25 = vperm.slane %v2219_v53, 0  ;;  %v1161_v28 = vperm.slane %v2219_v53, 1 }
 0x413   :  { %v954_v54 = vsel %vm387_vm2, %v951_v9, %v953_v58  ;;  %v955_v36 = vsel %vm387_vm2, %v949_v55, %v951_v9  ;;  %v1158_v58 = vperm.slane %v2217_v49, 1  ;;  %v1156_v55 = vpop.permute.xlu2 %1155 }
 0x414   :  { %v959_v56 = vmul.f32 %v955_v36, %v1998_v44  ;;  %v960_v7 = vmul.f32 %v954_v54, %v1996_v43  ;;  %v1141_v32 = vmul.f32 %v1137_v15, %v1135_v62  ;;  %v1144_v35 = vmul.f32 %v1140_v25, %v1135_v62 }
 0x415   :  { %v1162_v9 = vmul.f32 %v1158_v58, %v1156_v55  ;;  %v1165_v54 = vmul.f32 %v1161_v28, %v1156_v55 }
 0x416   :  { %v2229_v3 = vadd.f32 %v959_v56, %v943_v52  ;;  %v2231_v27 = vadd.f32 %v960_v7, %v944_v45 }
 0x418   :  { %v1138_v14 = vperm.slane %v2229_v3, 0  ;;  %v1139_v22 = vperm.slane %v2231_v27, 0  ;;  %v1159_v17 = vperm.slane %v2229_v3, 1  ;;  %v1160_v47 = vperm.slane %v2231_v27, 1 }
 0x41a   :  { %v1142_v41 = vmul.f32 %v1138_v14, %v1135_v62  ;;  %v1143_v48 = vmul.f32 %v1139_v22, %v1135_v62  ;;  %v1148_v26 = vpop.permute.xlu1 %1147  ;;  %v1163_v52 = vmul.f32 %v1159_v17, %v1156_v55  ;;  %v1164_v56 = vmul.f32 %v1160_v47, %v1156_v55 }
 0x41b   :  { %v1150_v36 = vadd.f32 %v1148_v26, %v1141_v32  ;;  %v1153_v45 = vadd.f32 %v1148_v26, %v1144_v35 }
 0x41c   :  { %v1151_v7 = vadd.f32 %v1148_v26, %v1142_v41  ;;  %v1152_v2 = vadd.f32 %v1148_v26, %v1143_v48 }
 0x41d   :  { %v1166_v5 = vadd.f32 %v1162_v9, %v1150_v36  ;;  %v1169_v1 = vadd.f32 %v1165_v54, %v1153_v45 }
 0x41e   :  { %v1167_v0 = vadd.f32 %v1163_v52, %v1151_v7  ;;  %v1168_v15 = vadd.f32 %v1164_v56, %v1152_v2 }
 0x41f   :  { %v1548_v25 = vmul.f32 -1.442695, %v1166_v5  ;;  %v1551_v16 = vmul.f32 -1.442695, %v1169_v1 }
 0x420   :  { %v1549_v39 = vmul.f32 -1.442695, %v1167_v0  ;;  %v1550_v43 = vmul.f32 -1.442695, %v1168_v15 }
 0x421   :  { %1641 = vpow2.f32 %v1548_v25 }
 0x422   :  { %1643 = vpow2.f32 %v1549_v39 }
 0x423   :  { %1645 = vpow2.f32 %v1550_v43 }
 0x424   :  { %1647 = vpow2.f32 %v1551_v16 }
 0x427   :  { %v1642_v62 = vpop.eup %1641 }
 0x428   :  { %v1644_v58 = vpop.eup %1643  ;;  %v1182_v28 = vadd.f32 1.0, %v1642_v62 }
 0x429   :  { %v1646_v14 = vpop.eup %1645  ;;  %v1183_v22 = vadd.f32 1.0, %v1644_v58 }
 0x42a   :  { %v1648_v55 = vpop.eup %1647  ;;  %v1184_v32 = vadd.f32 1.0, %v1646_v14  ;;  %1649 = vrcp.f32 %v1182_v28  ;;  %vm1191_vm12 = vweird.f32 %v1182_v28  ;;  %v1195_v39 = vand.u32 2147483647, %v1182_v28 }
 0x42b   :  { %v1185_v35 = vadd.f32 1.0, %v1648_v55  ;;  %1651 = vrcp.f32 %v1183_v22  ;;  %v1197_v47 = vand.u32 2147483648, %v1182_v28  ;;  %vm1206_vm13 = vweird.f32 %v1183_v22 }
 0x42c   :  { %1653 = vrcp.f32 %v1184_v32  ;;  %v1225_v48 = vand.u32 2147483647, %v1184_v32  ;;  %v1227_v26 = vand.u32 2147483648, %v1184_v32  ;;  %v1212_v52 = vand.u32 2147483648, %v1183_v22 }
 0x42d   :  { %1655 = vrcp.f32 %v1185_v35  ;;  %v1210_v7 = vand.u32 2147483647, %v1183_v22  ;;  %vm1196_vm4 = vcmp.eq.f32.partialorder %v1195_v39, 8.507059e+37  ;;  %v1198_v58 = vor.u32 1.1754944e-38, %v1197_v47 }
 0x42e   :  { %vm1221_vm7 = vweird.f32 %v1184_v32  ;;  %vm1226_vm8 = vcmp.eq.f32.partialorder %v1225_v48, 8.507059e+37 }
 0x42f   :  { %vm1211_vm11 = vcmp.eq.f32.partialorder %v1210_v7, 8.507059e+37 }
 0x430   :  { %v1650_v2 = vpop.eup %1649 }
 0x431   :  { %v1652_v0 = vpop.eup %1651  ;;  %v1187_v5 = vmul.f32 %v1650_v2, %v1182_v28  ;;  %vm1192_vm14 = vweird.f32 %v1650_v2 }
 0x432   :  { %v1654_v1 = vpop.eup %1653  ;;  %v1202_v43 = vmul.f32 %v1652_v0, %v1183_v22  ;;  %vm1207_vm15 = vweird.f32 %v1652_v0  ;;  %vm1193_vm6 = vmor %vm1191_vm12, %vm1192_vm14  ;;  %v1242_v22 = vand.u32 2147483648, %v1185_v35 }
 0x433   :  { %v1656_v16 = vpop.eup %1655  ;;  %v1188_v17 = vsub.f32 1.0, %v1187_v5  ;;  %v1217_v41 = vmul.f32 %v1654_v1, %v1184_v32  ;;  %vm1222_vm5 = vweird.f32 %v1654_v1  ;;  %vm1208_vm9 = vmor %vm1206_vm13, %vm1207_vm15  ;;  %vm1236_vm13 = vweird.f32 %v1185_v35 }
 0x434   :  { %v1203_v9 = vsub.f32 1.0, %v1202_v43  ;;  %v1232_v54 = vmul.f32 %v1656_v16, %v1185_v35  ;;  %vm1223_vm10 = vmor %vm1221_vm7, %vm1222_vm5  ;;  %vm1237_vm12 = vweird.f32 %v1656_v16 }
 0x435   :  { %v1189_v36 = vmul.f32 %v1650_v2, %v1188_v17  ;;  %v1218_v45 = vsub.f32 1.0, %v1217_v41  ;;  %v1213_v17 = vor.u32 1.1754944e-38, %v1212_v52  ;;  %vm1238_vm14 = vmor %vm1236_vm13, %vm1237_vm12  ;;  %v2277_v52 = vpop.permute.xlu1 %239 }
 0x436   :  { %v1204_v56 = vmul.f32 %v1652_v0, %v1203_v9  ;;  %v1233_v15 = vsub.f32 1.0, %v1232_v54  ;;  %v1228_v9 = vor.u32 1.1754944e-38, %v1227_v26  ;;  %v1243_v26 = vor.u32 1.1754944e-38, %v1242_v22 }
 0x437   :  { %v1190_v25 = vadd.f32 %v1650_v2, %v1189_v36  ;;  %v1219_v62 = vmul.f32 %v1654_v1, %v1218_v45  ;;  %v2779_v54 = vmov 0   ;;  %v2780_v36 = vmov 1   ;;  %v2275_v45 = vpop.permute.xlu2 %253 }
 0x438   :  { %v1205_v14 = vadd.f32 %v1652_v0, %v1204_v56  ;;  %v1234_v55 = vmul.f32 %v1656_v16, %v1233_v15 }
 0x439   :  { %v1194_v5 = vsel %vm1193_vm6, %v1650_v2, %v1190_v25  ;;  %v1220_v43 = vadd.f32 %v1654_v1, %v1219_v62 }
 0x43a   :  { %v2242_v41 = vsel %vm1196_vm4, %v1198_v58, %v1194_v5  ;;  %v1209_v39 = vsel %vm1208_vm9, %v1652_v0, %v1205_v14  ;;  %v1235_v47 = vadd.f32 %v1656_v16, %v1234_v55  ;;  %v1240_v0 = vand.u32 2147483647, %v1185_v35  ;;  %v616_v35 = vld [vmem:[%s2764_s6] sm:$0x3] }
 0x43b   :  { %1246 = vrot.lane.b32.xlu0 %v2242_v41, %s1762_s0  ;;  %v1224_v28 = vsel %vm1223_vm10, %v1654_v1, %v1220_v43  ;;  %v2246_v32 = vsel %vm1211_vm11, %v1213_v17, %v1209_v39 }
 0x43c   :  { %v2248_v2 = vsel %vm1226_vm8, %v1228_v9, %v1224_v28  ;;  %1248 = vrot.lane.b32.xlu1 %v2246_v32, %s1762_s0  ;;  %v1239_v48 = vsel %vm1238_vm14, %v1656_v16, %v1235_v47  ;;  %vm1241_vm15 = vcmp.eq.f32.partialorder %v1240_v0, 8.507059e+37  ;;  %v617_v16 = vld [vmem:[%s2765_s7] sm:$0x3] }
 0x43d   :  { %1250 = vrot.lane.b32.xlu2 %v2248_v2, %s1762_s0  ;;  %v2254_v1 = vsel %vm1241_vm15, %v1243_v26, %v1239_v48 }
 0x443   :  { %1252 = vrot.lane.b32.xlu0 %v2254_v1, %s1762_s0 }
 0x444   :  { %1266 = vrot.lane.b32.xlu1 %v2242_v41, %s1763_s3 }
 0x445   :  { %1268 = vrot.lane.b32.xlu2 %v2246_v32, %s1763_s3 }
 0x44b   :  { %1270 = vrot.lane.b32.xlu0 %v2248_v2, %s1763_s3 }
 0x44c   :  { %1272 = vrot.lane.b32.xlu1 %v2254_v1, %s1763_s3 }
 0x44d   :  { %261 = vperm.xlu2 %1583, %v2191_v11  }
 0x453   :  { %620 = vperm.xlu0 %1580, %v616_v35  }
 0x454   :  { %633 = vperm.xlu1 %1576, %v617_v16  }
 0x455   :  { %1585 = vset.pattern.permute.xlu2 %v2779_v54 }
 0x45c   :  { %1584 = vset.pattern.permute.xlu1 %v2780_v36 }
 0x45d   :  { %641 = vperm.xlu1 %1584, %v616_v35  }
 0x497   :  { %v1251_v56 = vpop.permute.xlu2 %1250 }
 0x49f   :  { %v1269_v62 = vpop.permute.xlu2 %1268 }
 0x4ad   :  { %v1247_v7 = vpop.permute.xlu0 %1246 }
 0x4ae   :  { %v1249_v15 = vpop.permute.xlu1 %1248 }
 0x4af   :  { %v1256_v43 = vsel %vm286_vm0, %v1247_v7, %v1249_v15  ;;  %v1255_v9 = vsel %vm286_vm0, %v1249_v15, %v1251_v56 }
 0x4b0   :  { %v1259_v47 = vmul.f32 %v1256_v43, %v1889_v21  ;;  %v1768_v43 = vmov 5  }
 0x4b2   :  { %v1263_v35 = vadd.f32 %v1259_v47, %v2246_v32  ;;  %v610_v47 = vmul.f32 0.11111111, %v2112_v46 }
 0x4b5   :  { %v1253_v25 = vpop.permute.xlu0 %1252 }
 0x4b6   :  { %v1257_v58 = vsel %vm286_vm0, %v1253_v25, %v1247_v7  ;;  %v1267_v14 = vpop.permute.xlu1 %1266  ;;  %v1254_v39 = vsel %vm286_vm0, %v1251_v56, %v1253_v25 }
 0x4b7   :  { %v1258_v55 = vmul.f32 %v1257_v58, %v1880_v18  ;;  %v1276_v5 = vsel %vm321_vm1, %v1267_v14, %v1269_v62  ;;  %v1260_v18 = vmul.f32 %v1255_v9, %v1906_v34  ;;  %v1261_v0 = vmul.f32 %v1254_v39, %v1904_v33 }
 0x4b8   :  { %v1278_v17 = vmul.f32 %v1276_v5, %v1902_v30  ;;  %v1766_v58 = vmov 4   ;;  %v1767_v5 = vmov 6   ;;  %v608_v39 = vmul.f32 0.11111111, %v2098_v19 }
 0x4b9   :  { %v1262_v28 = vadd.f32 %v1258_v55, %v2242_v41  ;;  %v1264_v33 = vadd.f32 %v1260_v18, %v2248_v2  ;;  %v1265_v54 = vadd.f32 %v1261_v0, %v2254_v1  ;;  %v2782_v55 = vmov 3  }
 0x4ba   :  { %v611_v18 = vmul.f32 0.11111111, %v2114_v10  ;;  %v612_v0 = vsub.f32 %v2014_v57, %v608_v39 }
 0x4bb   :  { %v2293_v22 = vadd.f32 %v1278_v17, %v1262_v28  ;;  %v1769_v17 = vmov 7   ;;  %v609_v28 = vmul.f32 0.11111111, %v2100_v37 }
 0x4bc   :  { %v644_v19 = vperm.slane %v612_v0, 1 }
 0x4bd   :  { %v1271_v48 = vpop.permute.xlu0 %1270  ;;  %1286 = vrot.lane.b32.xlu2 %v2293_v22, %s1764_s1 }
 0x4be   :  { %v1275_v30 = vsel %vm321_vm1, %v1269_v62, %v1271_v48  ;;  %v1273_v26 = vpop.permute.xlu1 %1272  ;;  %v1553_v62 = vld [vmem:[%s2765_s7 + $0x4] sm:$0x3] }
 0x4bf   :  { %v1279_v16 = vmul.f32 %v1275_v30, %v1900_v29  ;;  %v1274_v21 = vsel %vm321_vm1, %v1271_v48, %v1273_v26  ;;  %v1277_v34 = vsel %vm321_vm1, %v1273_v26, %v1267_v14  ;;  %v1540_v29 = vld [vmem:[%s2764_s6 + $0x2] sm:$0x3]  ;;  %v2781_v14 = vmov 2  }
 0x4c0   :  { %v1280_v36 = vmul.f32 %v1274_v21, %v1928_v50  ;;  %v1281_v56 = vmul.f32 %v1277_v34, %v1930_v51  ;;  %v1541_v50 = vld [vmem:[%s2765_s7 + $0x2] sm:$0x3]  ;;  %v1552_v51 = vld [vmem:[%s2764_s6 + $0x4] sm:$0x3]  ;;  %v613_v48 = vsub.f32 %v2016_v60, %v609_v28  ;;  %v614_v30 = vsub.f32 %v2020_v4, %v610_v47  ;;  %s1770_s6 = smov [#allocation5]  }
 0x4c1   :  { %v2311_v7 = vadd.f32 %v1279_v16, %v1263_v35  ;;  %v615_v35 = vsub.f32 %v2026_v13, %v611_v18  ;;  %v623_v16 = vperm.slane %v612_v0, 0  ;;  %s1510_s7 = sshll.u32 %s1770_s6, 4  ;;  %s1511_s7 = int_to_ptr.vmem [resolvable:$true] %s1510_s7 }
 0x4c2   :  { %v2313_v15 = vadd.f32 %v1280_v36, %v1264_v33  ;;  %v2315_v25 = vadd.f32 %v1281_v56, %v1265_v54  ;;  %v625_v33 = vperm.slane %v614_v30, 0  ;;  %v645_v54 = vperm.slane %v613_v48, 1 }
 0x4c3   :  { %1288 = vrot.lane.b32.xlu0 %v2311_v7, %s1764_s1  ;;  %v626_v46 = vperm.slane %v615_v35, 0  ;;  %v646_v56 = vperm.slane %v614_v30, 1 }
 0x4c4   :  { %1290 = vrot.lane.b32.xlu1 %v2313_v15, %s1764_s1 }
 0x4c5   :  { %1292 = vrot.lane.b32.xlu2 %v2315_v25, %s1764_s1  ;;  %v621_v26 = vpop.permute.xlu0 %620 }
 0x4c6   :  { %v634_v9 = vpop.permute.xlu1 %633  ;;  %v627_v34 = vmul.f32 %v623_v16, %v621_v26  ;;  %v629_v10 = vmul.f32 %v625_v33, %v621_v26  ;;  %v2359_v16 = vpop.permute.xlu2 %261 }
 0x4cb   :  { %1306 = vrot.lane.b32.xlu0 %v2293_v22, %s1765_s27 }
 0x4cc   :  { %1308 = vrot.lane.b32.xlu1 %v2311_v7, %s1765_s27 }
 0x4cd   :  { %1310 = vrot.lane.b32.xlu2 %v2313_v15, %s1765_s27 }
 0x4cf   :  { %v642_v21 = vpop.permute.xlu1 %641 }
 0x4d0   :  { %v648_v36 = vmul.f32 %v644_v19, %v642_v21 }
 0x4d3   :  { %1312 = vrot.lane.b32.xlu0 %v2315_v25, %s1765_s27 }
 0x4d4   :  { %1001 = vperm.xlu1 %1584, %v1540_v29  }
 0x4d5   :  { %980 = vperm.xlu2 %1585, %v1540_v29   ;;  %v649_v29 = vmul.f32 %v645_v54, %v642_v21  ;;  %v966_v54 = vmul.f32 0.11111111, %v2217_v49 }
 0x4db   :  { %993 = vperm.xlu0 %1580, %v1541_v50   ;;  %v630_v50 = vmul.f32 %v626_v46, %v621_v26  ;;  %v969_v46 = vmul.f32 0.11111111, %v2219_v53  ;;  %v243_v53 = vperm.slane %v1848_v61, 0 }
 0x4dc   :  { %1361 = vperm.xlu1 %1584, %v1552_v51  }
 0x4dd   :  { %1340 = vperm.xlu2 %1585, %v1552_v51   ;;  %v636_v51 = vadd.f32 %v634_v9, %v627_v34  ;;  %v639_v39 = vadd.f32 %v634_v9, %v630_v50  ;;  %v2387_v49 = vsub.f32 %v2132_v38, %v969_v46 }
 0x4e3   :  { %1353 = vperm.xlu0 %1580, %v1553_v62   ;;  %v647_v62 = vperm.slane %v615_v35, 1 }
 0x4e4   :  { %1588 = vset.pattern.permute.xlu1 %v1766_v58 }
 0x4e5   :  { %1586 = vset.pattern.permute.xlu2 %v2781_v14  ;;  %1097 = vperm.xlu1 %1588, %v2191_v11   ;;  %v650_v14 = vmul.f32 %v646_v56, %v642_v21 }
 0x4e6   :  { %737 = vperm.xlu2 %1586, %v2191_v11  }
 0x4eb   :  { %1587 = vset.pattern.permute.xlu0 %v2782_v55  ;;  %v651_v55 = vmul.f32 %v647_v62, %v642_v21  ;;  %v244_v62 = vperm.slane %v1852_v63, 0 }
 0x4ec   :  { %753 = vperm.xlu0 %1587, %v2191_v11  }
 0x4ed   :  { %1590 = vset.pattern.permute.xlu1 %v1767_v5  ;;  %v652_v5 = vadd.f32 %v648_v36, %v636_v51  ;;  %v655_v47 = vadd.f32 %v651_v55, %v639_v39  ;;  %v967_v36 = vmul.f32 0.11111111, %v2229_v3  ;;  %v242_v3 = vperm.slane %v1846_v59, 0 }
 0x4ee   :  { %1457 = vperm.xlu1 %1590, %v2191_v11   ;;  %1589 = vset.pattern.permute.xlu2 %v1768_v43  ;;  %v638_v43 = vadd.f32 %v634_v9, %v629_v10  ;;  %v968_v10 = vmul.f32 0.11111111, %v2231_v27  ;;  %v264_v27 = vperm.slane %v1846_v59, 1  ;;  %v267_v39 = vperm.slane %v1858_v8, 1 }
 0x4ef   :  { %1113 = vperm.xlu2 %1589, %v2191_v11   ;;  %v1530_v18 = vmul.f32 -1.442695, %v652_v5  ;;  %v1533_v30 = vmul.f32 -1.442695, %v655_v47 }
 0x4f0   :  { %v654_v28 = vadd.f32 %v650_v14, %v638_v43  ;;  %v2397_v14 = vsub.f32 %v2124_v6, %v967_v36  ;;  %v2400_v55 = vsub.f32 %v2134_v40, %v968_v10  ;;  %v245_v43 = vperm.slane %v1858_v8, 0 }
 0x4f1   :  { %1657 = vpow2.f32 %v1530_v18 }
 0x4f2   :  { %v249_v8 = vmul.f32 %v245_v43, %v2277_v52 }
 0x4f4   :  { %1592 = vset.pattern.permute.xlu0 %v1769_v17 }
 0x4f7   :  { %1591 = vset.pattern.permute.xlu2 %v1769_v17 }
 0x4f8   :  { %1473 = vperm.xlu2 %1591, %v2191_v11   ;;  %v624_v11 = vperm.slane %v613_v48, 0  ;;  %v1532_v48 = vmul.f32 -1.442695, %v654_v28 }
 0x4fa   :  { %v628_v37 = vmul.f32 %v624_v11, %v621_v26  ;;  %v1658_v26 = vpop.eup %1657 }
 0x4fb   :  { %v2363_v34 = vadd.f32 1.0, %v1658_v26  ;;  %v268_v26 = vmul.f32 %v264_v27, %v2359_v16 }
 0x4fc   :  { %v637_v58 = vadd.f32 %v634_v9, %v628_v37 }
 0x4fd   :  { %vm677_vm0 = vweird.f32 %v2363_v34 }
 0x4fe   :  { %v653_v17 = vadd.f32 %v649_v29, %v637_v58  ;;  %v2382_v29 = vsub.f32 %v2122_v20, %v966_v54  ;;  %v265_v58 = vperm.slane %v1848_v61, 1  ;;  %v246_v61 = vmul.f32 %v242_v3, %v2277_v52 }
 0x500   :  { %v1531_v0 = vmul.f32 -1.442695, %v653_v17  ;;  %v266_v17 = vperm.slane %v1852_v63, 1  ;;  %v983_v59 = vperm.slane %v2382_v29, 0  ;;  %v248_v63 = vmul.f32 %v244_v62, %v2277_v52 }
 0x501   :  { %v269_v54 = vmul.f32 %v265_v58, %v2359_v16 }
 0x502   :  { %1659 = vpow2.f32 %v1531_v0  ;;  %v270_v46 = vmul.f32 %v266_v17, %v2359_v16  ;;  %v258_v58 = vadd.f32 %v2275_v45, %v248_v63  ;;  %v2435_v17 = vadd.f32 %v2275_v45, %v249_v8 }
 0x503   :  { %1661 = vpow2.f32 %v1532_v48  ;;  %v247_v48 = vmul.f32 %v243_v53, %v2277_v52  ;;  %v256_v53 = vadd.f32 %v2275_v45, %v246_v61 }
 0x504   :  { %1663 = vpow2.f32 %v1533_v30 }
 0x505   :  { %1665 = vrcp.f32 %v2363_v34  ;;  %v2443_v61 = vadd.f32 %v268_v26, %v256_v53 }
 0x508   :  { %v1660_v35 = vpop.eup %1659 }
 0x509   :  { %v1662_v21 = vpop.eup %1661  ;;  %v2365_v19 = vadd.f32 1.0, %v1660_v35 }
 0x50a   :  { %v1664_v9 = vpop.eup %1663  ;;  %v2367_v33 = vadd.f32 1.0, %v1662_v21  ;;  %v2441_v21 = vmul.f32 %v267_v39, %v2359_v16 }
 0x50b   :  { %v2369_v37 = vadd.f32 1.0, %v1664_v9  ;;  %1667 = vrcp.f32 %v2365_v19  ;;  %v2384_v50 = vpop.eup %1665  ;;  %v257_v9 = vadd.f32 %v2275_v45, %v247_v48  ;;  %v2449_v48 = vadd.f32 %v270_v46, %v258_v58 }
 0x50c   :  { %1669 = vrcp.f32 %v2367_v33  ;;  %v673_v18 = vmul.f32 %v2384_v50, %v2363_v34  ;;  %vm692_vm1 = vweird.f32 %v2365_v19  ;;  %vm678_vm4 = vweird.f32 %v2384_v50 }
 0x50d   :  { %1671 = vrcp.f32 %v2369_v37  ;;  %v2447_v43 = vadd.f32 %v269_v54, %v257_v9  ;;  %v696_v9 = vand.u32 2147483647, %v2365_v19  ;;  %v698_v54 = vand.u32 2147483648, %v2365_v19  ;;  %vm2495_vm8 = vmor %vm677_vm0, %vm678_vm4 }
 0x50e   :  { %v674_v27 = vsub.f32 1.0, %v673_v18  ;;  %v681_v18 = vand.u32 2147483647, %v2363_v34  ;;  %vm707_vm6 = vweird.f32 %v2367_v33  ;;  %vm722_vm12 = vweird.f32 %v2369_v37 }
 0x50f   :  { %vm697_vm13 = vcmp.eq.f32.partialorder %v696_v9, 8.507059e+37 }
 0x510   :  { %v675_v39 = vmul.f32 %v2384_v50, %v674_v27  ;;  %vm2465_vm5 = vcmp.eq.f32.partialorder %v681_v18, 8.507059e+37 }
 0x511   :  { %v2389_v51 = vpop.eup %1667 }
 0x512   :  { %v2402_v5 = vpop.eup %1669  ;;  %v688_v0 = vmul.f32 %v2389_v51, %v2365_v19  ;;  %v676_v18 = vadd.f32 %v2384_v50, %v675_v39  ;;  %vm693_vm7 = vweird.f32 %v2389_v51 }
 0x513   :  { %v2408_v28 = vpop.eup %1671  ;;  %v703_v10 = vmul.f32 %v2402_v5, %v2367_v33  ;;  %vm2505_vm10 = vmor %vm692_vm1, %vm693_vm7 }
 0x514   :  { %v718_v52 = vmul.f32 %v2408_v28, %v2369_v37  ;;  %v689_v62 = vsub.f32 1.0, %v688_v0  ;;  %v683_v0 = vand.u32 2147483648, %v2363_v34  ;;  %vm723_vm9 = vweird.f32 %v2408_v28 }
 0x515   :  { %v704_v63 = vsub.f32 1.0, %v703_v10  ;;  %vm2530_vm14 = vmor %vm722_vm12, %vm723_vm9 }
 0x516   :  { %v719_v45 = vsub.f32 1.0, %v718_v52  ;;  %v690_v26 = vmul.f32 %v2389_v51, %v689_v62  ;;  %v684_v10 = vor.u32 1.1754944e-38, %v683_v0  ;;  %v713_v0 = vand.u32 2147483648, %v2367_v33 }
 0x517   :  { %v2361_v11 = vpop.permute.xlu2 %1286  ;;  %v705_v62 = vmul.f32 %v2402_v5, %v704_v63 }
 0x518   :  { %v720_v58 = vmul.f32 %v2408_v28, %v719_v45  ;;  %v691_v35 = vadd.f32 %v2389_v51, %v690_v26  ;;  %v2789_v26 = vld [vmem:[#allocation8_spill] sm:$0xff] }
 0x51a   :  { %v721_v34 = vadd.f32 %v2408_v28, %v720_v58 }
 0x51c   :  { %v725_v9 = vsel %vm2530_vm14, %v2408_v28, %v721_v34  ;;  %v2555_v28 = vadd.f32 %v2441_v21, %v2435_v17 }
 0x51f   :  { %v2379_v56 = vpop.permute.xlu2 %1292 }
 0x520   :  { %v1297_v8 = vsel %vm354_vm3, %v2379_v56, %v2361_v11 }
 0x521   :  { %v1298_v52 = vmul.f32 %v1297_v8, %v1971_v24 }
 0x527   :  { %v2437_v30 = vpop.permute.xlu2 %1310 }
 0x535   :  { %v1289_v36 = vpop.permute.xlu0 %1288 }
 0x536   :  { %v1291_v3 = vpop.permute.xlu1 %1290  ;;  %v1296_v16 = vsel %vm354_vm3, %v2361_v11, %v1289_v36  ;;  %v711_v11 = vand.u32 2147483647, %v2367_v33 }
 0x537   :  { %v1299_v53 = vmul.f32 %v1296_v16, %v1969_v23  ;;  %v1294_v24 = vsel %vm354_vm3, %v1291_v3, %v2379_v56  ;;  %v1295_v23 = vsel %vm354_vm3, %v1289_v36, %v1291_v3  ;;  %vm708_vm3 = vweird.f32 %v2402_v5  ;;  %v981_v3 = vpop.permute.xlu2 %980 }
 0x538   :  { %v1302_v36 = vadd.f32 %v1298_v52, %v2293_v22  ;;  %v1300_v39 = vmul.f32 %v1295_v23, %v1978_v31  ;;  %v680_v22 = vsel %vm2495_vm8, %v2384_v50, %v676_v18  ;;  %vm2523_vm11 = vmor %vm707_vm6, %vm708_vm3  ;;  %v714_v31 = vor.u32 1.1754944e-38, %v713_v0 }
 0x539   :  { %v685_v33 = vsel %vm2465_vm5, %v684_v10, %v680_v22  ;;  %vm712_vm15 = vcmp.eq.f32.partialorder %v711_v11, 8.507059e+37  ;;  %v2798_v22 = vperm.slane %v2387_v49, 0 }
 0x53a   :  { %v1304_v0 = vadd.f32 %v1300_v39, %v2313_v15 }
 0x53d   :  { %v1307_v27 = vpop.permute.xlu0 %1306 }
 0x53e   :  { %v1309_v47 = vpop.permute.xlu1 %1308 }
 0x53f   :  { %v1315_v63 = vsel %vm387_vm2, %v1309_v47, %v2437_v30  ;;  %v1316_v45 = vsel %vm387_vm2, %v1307_v27, %v1309_v47  ;;  %v1303_v47 = vadd.f32 %v1299_v53, %v2311_v7  ;;  %v695_v7 = vsel %vm2505_vm10, %v2389_v51, %v691_v35  ;;  %v1341_v17 = vpop.permute.xlu2 %1340 }
 0x540   :  { %v1318_v8 = vmul.f32 %v1316_v45, %v1992_v42  ;;  %v1319_v16 = vmul.f32 %v1315_v63, %v1998_v44  ;;  %v706_v44 = vadd.f32 %v2402_v5, %v705_v62  ;;  %v1301_v63 = vmul.f32 %v1294_v24, %v2789_v26  ;;  %v2794_v45 = vld [vmem:[#allocation10_spill] sm:$0xff] }
 0x541   :  { %v699_v53 = vor.u32 1.1754944e-38, %v698_v54  ;;  %v726_v51 = vand.u32 2147483647, %v2369_v37  ;;  %v728_v35 = vand.u32 2147483648, %v2369_v37  ;;  %v2797_v26 = vperm.slane %v2400_v55, 0 }
 0x542   :  { %v1322_v19 = vadd.f32 %v1318_v8, %v1302_v36  ;;  %v1323_v52 = vadd.f32 %v1319_v16, %v1303_v47  ;;  %v710_v58 = vsel %vm2523_vm11, %v2402_v5, %v706_v44  ;;  %v1305_v24 = vadd.f32 %v1301_v63, %v2315_v25  ;;  %v2795_v8 = vld [vmem:[#allocation9_spill] sm:$0xff] }
 0x543   :  { %v700_v54 = vsel %vm697_vm13, %v699_v53, %v695_v7  ;;  %vm727_vm0 = vcmp.eq.f32.partialorder %v726_v51, 8.507059e+37  ;;  %v729_v15 = vor.u32 1.1754944e-38, %v728_v35  ;;  %v715_v56 = vsel %vm712_vm15, %v714_v31, %v710_v58 }
 0x544   :  { %v1326_v10 = vmul.f32 0.11111111, %v1322_v19  ;;  %v1327_v23 = vmul.f32 0.11111111, %v1323_v52  ;;  %v987_v36 = vmul.f32 %v983_v59, %v981_v3  ;;  %v2796_v47 = vperm.slane %v2397_v14, 0 }
 0x545   :  { %v1313_v18 = vpop.permute.xlu0 %1312  ;;  %v730_v44 = vsel %vm727_vm0, %v729_v15, %v725_v9  ;;  %v2565_v21 = vadd.f32 %v700_v54, %v2016_v60  ;;  %v989_v63 = vmul.f32 %v2797_v26, %v981_v3  ;;  %v990_v59 = vmul.f32 %v2798_v22, %v981_v3 }
 0x546   :  { %v1314_v37 = vsel %vm387_vm2, %v2437_v30, %v1313_v18  ;;  %v1317_v46 = vsel %vm387_vm2, %v1313_v18, %v1307_v27  ;;  %v1002_v25 = vpop.permute.xlu1 %1001  ;;  %v2558_v30 = vadd.f32 %v685_v33, %v2014_v57  ;;  %v988_v42 = vmul.f32 %v2796_v47, %v981_v3 }
 0x547   :  { %v1320_v5 = vmul.f32 %v1314_v37, %v2794_v45  ;;  %v1321_v16 = vmul.f32 %v1317_v46, %v2795_v8  ;;  %v1330_v11 = vsub.f32 %v2242_v41, %v1326_v10  ;;  %v1331_v34 = vsub.f32 %v2246_v32, %v1327_v23 }
 0x548   :  { %v2799_v7 = vperm.slane %v2382_v29, 1  ;;  %v2800_v52 = vperm.slane %v2397_v14, 1  ;;  %v2801_v31 = vperm.slane %v2400_v55, 1  ;;  %v2802_v51 = vperm.slane %v2387_v49, 1 }
 0x549   :  { %v1324_v12 = vadd.f32 %v1320_v5, %v1304_v0  ;;  %v1325_v27 = vadd.f32 %v1321_v16, %v1305_v24  ;;  %v1343_v29 = vperm.slane %v1330_v11, 0  ;;  %v1344_v18 = vperm.slane %v1331_v34, 0 }
 0x54a   :  { %v1008_v19 = vmul.f32 %v2799_v7, %v1002_v25  ;;  %v1009_v60 = vmul.f32 %v2800_v52, %v1002_v25  ;;  %v1010_v50 = vmul.f32 %v2801_v31, %v1002_v25  ;;  %v1011_v35 = vmul.f32 %v2802_v51, %v1002_v25 }
 0x54b   :  { %v1328_v39 = vmul.f32 0.11111111, %v1324_v12  ;;  %v1329_v57 = vmul.f32 0.11111111, %v1325_v27  ;;  %v2584_v14 = vadd.f32 %v715_v56, %v2020_v4  ;;  %v740_v55 = vperm.slane %v2558_v30, 0 }
 0x54c   :  { %v741_v49 = vperm.slane %v2565_v21, 0  ;;  %v756_v45 = vperm.slane %v2558_v30, 1  ;;  %v2590_v5 = vadd.f32 %v730_v44, %v2026_v13  ;;  %v1364_v56 = vperm.slane %v1330_v11, 1 }
 0x54d   :  { %v1332_v53 = vsub.f32 %v2248_v2, %v1328_v39  ;;  %v1333_v62 = vsub.f32 %v2254_v1, %v1329_v57  ;;  %v994_v33 = vpop.permute.xlu0 %993  ;;  %v1347_v27 = vmul.f32 %v1343_v29, %v1341_v17  ;;  %v1348_v47 = vmul.f32 %v1344_v18, %v1341_v17  ;;  %v738_v39 = vpop.permute.xlu2 %737 }
 0x54e   :  { %v996_v54 = vadd.f32 %v994_v33, %v987_v36  ;;  %v997_v58 = vadd.f32 %v994_v33, %v988_v42  ;;  %v998_v3 = vadd.f32 %v994_v33, %v989_v63  ;;  %v999_v9 = vadd.f32 %v994_v33, %v990_v59  ;;  %v1362_v4 = vpop.permute.xlu1 %1361 }
 0x54f   :  { %v1345_v0 = vperm.slane %v1332_v53, 0  ;;  %v1346_v23 = vperm.slane %v1333_v62, 0  ;;  %v1366_v12 = vperm.slane %v1332_v53, 1  ;;  %v1367_v36 = vperm.slane %v1333_v62, 1 }
 0x550   :  { %v1012_v24 = vadd.f32 %v1008_v19, %v996_v54  ;;  %v1013_v37 = vadd.f32 %v1009_v60, %v997_v58  ;;  %v1014_v46 = vadd.f32 %v1010_v50, %v998_v3  ;;  %v1015_v10 = vadd.f32 %v1011_v35, %v999_v9 }
 0x551   :  { %v1349_v42 = vmul.f32 %v1345_v0, %v1341_v17  ;;  %v1365_v57 = vperm.slane %v1331_v34, 1  ;;  %v1368_v26 = vmul.f32 %v1364_v56, %v1362_v4  ;;  %v1350_v63 = vmul.f32 %v1346_v23, %v1341_v17 }
 0x552   :  { %v1542_v8 = vmul.f32 -1.442695, %v1012_v24  ;;  %v1543_v16 = vmul.f32 -1.442695, %v1013_v37  ;;  %v1544_v15 = vmul.f32 -1.442695, %v1014_v46  ;;  %v1370_v7 = vmul.f32 %v1366_v12, %v1362_v4 }
 0x553   :  { %v1545_v25 = vmul.f32 -1.442695, %v1015_v10  ;;  %v1369_v59 = vmul.f32 %v1365_v57, %v1362_v4  ;;  %v744_v19 = vmul.f32 %v740_v55, %v738_v39  ;;  %v745_v52 = vmul.f32 %v741_v49, %v738_v39 }
 0x554   :  { %1673 = vpow2.f32 %v1542_v8  ;;  %v1371_v60 = vmul.f32 %v1367_v36, %v1362_v4  ;;  %v742_v62 = vperm.slane %v2584_v14, 0  ;;  %v743_v31 = vperm.slane %v2590_v5, 0 }
 0x555   :  { %1675 = vpow2.f32 %v1543_v16  ;;  %v1354_v30 = vpop.permute.xlu0 %1353  ;;  %v757_v33 = vperm.slane %v2565_v21, 1  ;;  %v758_v54 = vperm.slane %v2584_v14, 1  ;;  %v759_v18 = vperm.slane %v2590_v5, 1 }
 0x556   :  { %1677 = vpow2.f32 %v1544_v15  ;;  %v1356_v13 = vadd.f32 %v1354_v30, %v1347_v27  ;;  %v1357_v44 = vadd.f32 %v1354_v30, %v1348_v47  ;;  %v1358_v22 = vadd.f32 %v1354_v30, %v1349_v42 }
 0x557   :  { %1679 = vpow2.f32 %v1545_v25  ;;  %v1359_v11 = vadd.f32 %v1354_v30, %v1350_v63  ;;  %v746_v3 = vmul.f32 %v742_v62, %v738_v39  ;;  %v747_v9 = vmul.f32 %v743_v31, %v738_v39 }
 0x558   :  { %v1372_v53 = vadd.f32 %v1368_v26, %v1356_v13  ;;  %v1373_v34 = vadd.f32 %v1369_v59, %v1357_v44  ;;  %v1374_v50 = vadd.f32 %v1370_v7, %v1358_v22  ;;  %v748_v37 = vadd.f32 %v744_v19, %v2443_v61 }
 0x559   :  { %v1375_v17 = vadd.f32 %v1371_v60, %v1359_v11  ;;  %v749_v46 = vadd.f32 %v745_v52, %v2447_v43  ;;  %v750_v15 = vadd.f32 %v746_v3, %v2449_v48  ;;  %v751_v56 = vadd.f32 %v747_v9, %v2555_v28 }
 0x55a   :  { %v1674_v51 = vpop.eup %1673  ;;  %v1554_v35 = vmul.f32 -1.442695, %v1372_v53  ;;  %v1555_v21 = vmul.f32 -1.442695, %v1373_v34  ;;  %v1556_v14 = vmul.f32 -1.442695, %v1374_v50 }
 0x55b   :  { %v1676_v58 = vpop.eup %1675  ;;  %v2596_v29 = vadd.f32 1.0, %v1674_v51  ;;  %v1557_v23 = vmul.f32 -1.442695, %v1375_v17 }
 0x55c   :  { %v1678_v0 = vpop.eup %1677  ;;  %v2599_v24 = vadd.f32 1.0, %v1676_v58  ;;  %1681 = vpow2.f32 %v1554_v35 }
 0x55d   :  { %v1680_v10 = vpop.eup %1679  ;;  %v2603_v55 = vadd.f32 1.0, %v1678_v0  ;;  %1683 = vrcp.f32 %v2596_v29  ;;  %v1043_v8 = vand.u32 2147483648, %v2596_v29  ;;  %v1041_v25 = vand.u32 2147483647, %v2596_v29 }
 0x55e   :  { %v2606_v49 = vadd.f32 1.0, %v1680_v10  ;;  %1685 = vrcp.f32 %v2599_v24  ;;  %v754_v5 = vpop.permute.xlu0 %753  ;;  %vm1037_vm2 = vweird.f32 %v2596_v29  ;;  %v1058_v42 = vand.u32 2147483648, %v2599_v24 }
 0x55f   :  { %1687 = vrcp.f32 %v2603_v55  ;;  %v760_v61 = vmul.f32 %v756_v45, %v754_v5  ;;  %v761_v16 = vmul.f32 %v757_v33, %v754_v5  ;;  %v762_v43 = vmul.f32 %v758_v54, %v754_v5 }
 0x560   :  { %1689 = vrcp.f32 %v2606_v49  ;;  %v763_v4 = vmul.f32 %v759_v18, %v754_v5  ;;  %v1044_v27 = vor.u32 1.1754944e-38, %v1043_v8  ;;  %v1056_v45 = vand.u32 2147483647, %v2599_v24 }
 0x561   :  { %1691 = vpow2.f32 %v1555_v21  ;;  %v2615_v12 = vadd.f32 %v760_v61, %v748_v37  ;;  %v2617_v47 = vadd.f32 %v761_v16, %v749_v46  ;;  %v2624_v57 = vadd.f32 %v762_v43, %v750_v15 }
 0x562   :  { %v1682_v36 = vpop.eup %1681  ;;  %1693 = vpow2.f32 %v1556_v14  ;;  %vm1052_vm1 = vweird.f32 %v2599_v24  ;;  %v1071_v28 = vand.u32 2147483647, %v2603_v55  ;;  %v2628_v30 = vadd.f32 %v763_v4, %v751_v56 }
 0x563   :  { %v1684_v48 = vpop.eup %1683  ;;  %1695 = vpow2.f32 %v1557_v23  ;;  %v2622_v39 = vadd.f32 1.0, %v1682_v36  ;;  %vm2631_vm5 = vcmp.eq.f32.partialorder %v1041_v25, 8.507059e+37  ;;  %vm1067_vm6 = vweird.f32 %v2603_v55 }
 0x564   :  { %v1686_v26 = vpop.eup %1685  ;;  %v1033_v63 = vmul.f32 %v1684_v48, %v2596_v29  ;;  %vm1038_vm4 = vweird.f32 %v1684_v48  ;;  %vm2638_vm8 = vcmp.eq.f32.partialorder %v1056_v45, 8.507059e+37  ;;  %v1059_v7 = vor.u32 1.1754944e-38, %v1058_v42  ;;  %v1114_v42 = vpop.permute.xlu2 %1113 }
 0x565   :  { %v1688_v44 = vpop.eup %1687  ;;  %1697 = vrcp.f32 %v2622_v39  ;;  %v1048_v22 = vmul.f32 %v1686_v26, %v2599_v24  ;;  %vm1053_vm7 = vweird.f32 %v1686_v26  ;;  %vm2643_vm9 = vcmp.eq.f32.partialorder %v1071_v28, 8.507059e+37  ;;  %vm1039_vm12 = vmor %vm1037_vm2, %vm1038_vm4 }
 0x566   :  { %v1690_v11 = vpop.eup %1689  ;;  %v1034_v19 = vsub.f32 1.0, %v1033_v63  ;;  %v1063_v52 = vmul.f32 %v1688_v44, %v2603_v55  ;;  %vm1068_vm3 = vweird.f32 %v1688_v44  ;;  %v1073_v53 = vand.u32 2147483648, %v2603_v55  ;;  %vm1054_vm14 = vmor %vm1052_vm1, %vm1053_vm7 }
 0x567   :  { %v1692_v62 = vpop.eup %1691  ;;  %v1049_v31 = vsub.f32 1.0, %v1048_v22  ;;  %v1078_v34 = vmul.f32 %v1690_v11, %v2606_v49  ;;  %vm1082_vm10 = vweird.f32 %v2606_v49  ;;  %vm1083_vm11 = vweird.f32 %v1690_v11  ;;  %vm1069_vm15 = vmor %vm1067_vm6, %vm1068_vm3 }
 0x568   :  { %v1694_v50 = vpop.eup %1693  ;;  %v2650_v51 = vadd.f32 1.0, %v1692_v62  ;;  %v1035_v17 = vmul.f32 %v1684_v48, %v1034_v19  ;;  %v1064_v35 = vsub.f32 1.0, %v1063_v52  ;;  %v1074_v33 = vor.u32 1.1754944e-38, %v1073_v53  ;;  %vm1084_vm0 = vmor %vm1082_vm10, %vm1083_vm11 }
 0x569   :  { %v1696_v54 = vpop.eup %1695  ;;  %v2652_v58 = vadd.f32 1.0, %v1694_v50  ;;  %v1050_v3 = vmul.f32 %v1686_v26, %v1049_v31  ;;  %v1079_v9 = vsub.f32 1.0, %v1078_v34  ;;  %v1086_v18 = vand.u32 2147483647, %v2606_v49 }
 0x56a   :  { %v2655_v0 = vadd.f32 1.0, %v1696_v54  ;;  %1699 = vrcp.f32 %v2650_v51  ;;  %v1036_v37 = vadd.f32 %v1684_v48, %v1035_v17  ;;  %v1065_v46 = vmul.f32 %v1688_v44, %v1064_v35 }
 0x56b   :  { %v2658_v10 = vpop.eup %1697  ;;  %1701 = vrcp.f32 %v2652_v58  ;;  %v1051_v21 = vadd.f32 %v1686_v26, %v1050_v3  ;;  %v1080_v14 = vmul.f32 %v1690_v11, %v1079_v9  ;;  %vm2664_vm13 = vcmp.eq.f32.partialorder %v1086_v18, 8.507059e+37 }
 0x56c   :  { %1703 = vrcp.f32 %v2655_v0  ;;  %v1040_v5 = vsel %vm1039_vm12, %v1684_v48, %v1036_v37  ;;  %v1066_v8 = vadd.f32 %v1688_v44, %v1065_v46  ;;  %v1088_v61 = vand.u32 2147483648, %v2606_v49 }
 0x56d   :  { %v1045_v29 = vsel %vm2631_vm5, %v1044_v27, %v1040_v5  ;;  %v1055_v16 = vsel %vm1054_vm14, %v1686_v26, %v1051_v21  ;;  %v1081_v43 = vadd.f32 %v1690_v11, %v1080_v14  ;;  %v1393_v15 = vmul.f32 %v2658_v10, %v2622_v39  ;;  %v1098_v27 = vpop.permute.xlu1 %1097 }
 0x56e   :  { %v1060_v4 = vsel %vm2638_vm8, %v1059_v7, %v1055_v16  ;;  %v1070_v24 = vsel %vm1069_vm15, %v1688_v44, %v1066_v8  ;;  %v1089_v25 = vor.u32 1.1754944e-38, %v1088_v61  ;;  %v1092_v56 = vadd.f32 %v1045_v29, %v2122_v20 }
 0x56f   :  { %v1075_v55 = vsel %vm2643_vm9, %v1074_v33, %v1070_v24  ;;  %v1085_v36 = vsel %vm1084_vm0, %v1690_v11, %v1081_v43  ;;  %v1093_v45 = vadd.f32 %v1060_v4, %v2124_v6  ;;  %v1394_v48 = vsub.f32 1.0, %v1393_v15 }
 0x570   :  { %v2689_v28 = vpop.eup %1699  ;;  %v1090_v26 = vsel %vm2664_vm13, %v1089_v25, %v1085_v36  ;;  %v1094_v49 = vadd.f32 %v1075_v55, %v2134_v40  ;;  %v1100_v63 = vperm.slane %v1092_v56, 0  ;;  %v1116_v13 = vperm.slane %v1092_v56, 1 }
 0x571   :  { %v2694_v44 = vpop.eup %1701  ;;  %v1095_v20 = vadd.f32 %v1090_v26, %v2132_v38  ;;  %v1101_v22 = vperm.slane %v1093_v45, 0  ;;  %v1117_v59 = vperm.slane %v1093_v45, 1  ;;  %v1395_v7 = vmul.f32 %v2658_v10, %v1394_v48 }
 0x572   :  { %v2698_v6 = vpop.eup %1703  ;;  %v1102_v11 = vperm.slane %v1094_v49, 0  ;;  %v1104_v19 = vmul.f32 %v1100_v63, %v1098_v27  ;;  %v1118_v52 = vperm.slane %v1094_v49, 1  ;;  %v1120_v60 = vmul.f32 %v1116_v13, %v1114_v42 }
 0x573   :  { %v1103_v53 = vperm.slane %v1095_v20, 0  ;;  %v1105_v62 = vmul.f32 %v1101_v22, %v1098_v27  ;;  %v1119_v31 = vperm.slane %v1095_v20, 1  ;;  %v1121_v40 = vmul.f32 %v1117_v59, %v1114_v42 }
 0x574   :  { %v1106_v34 = vmul.f32 %v1102_v11, %v1098_v27  ;;  %v1108_v50 = vadd.f32 %v1104_v19, %v2615_v12  ;;  %v1122_v17 = vmul.f32 %v1118_v52, %v1114_v42  ;;  %v1396_v38 = vadd.f32 %v2658_v10, %v1395_v7 }
 0x575   :  { %v1107_v35 = vmul.f32 %v1103_v53, %v1098_v27  ;;  %v1109_v33 = vadd.f32 %v1105_v62, %v2617_v47  ;;  %v1123_v54 = vmul.f32 %v1119_v31, %v1114_v42  ;;  %vm1397_vm2 = vweird.f32 %v2622_v39  ;;  %v1458_v36 = vpop.permute.xlu1 %1457 }
 0x576   :  { %v1110_v3 = vadd.f32 %v1106_v34, %v2624_v57  ;;  %v1124_v9 = vadd.f32 %v1120_v60, %v1108_v50  ;;  %vm1398_vm1 = vweird.f32 %v2658_v10  ;;  %v1401_v18 = vand.u32 2147483647, %v2622_v39 }
 0x577   :  { %v1111_v37 = vadd.f32 %v1107_v35, %v2628_v30  ;;  %v1125_v46 = vadd.f32 %v1121_v40, %v1109_v33  ;;  %v1403_v12 = vand.u32 2147483648, %v2622_v39  ;;  %v1408_v21 = vmul.f32 %v2689_v28, %v2650_v51  ;;  %vm1399_vm4 = vmor %vm1397_vm2, %vm1398_vm1 }
 0x578   :  { %v2711_v14 = vadd.f32 %v1122_v17, %v1110_v3  ;;  %v1400_v57 = vsel %vm1399_vm4, %v2658_v10, %v1396_v38  ;;  %v1416_v8 = vand.u32 2147483647, %v2650_v51  ;;  %v1418_v61 = vand.u32 2147483648, %v2650_v51 }
 0x579   :  { %v2713_v47 = vadd.f32 %v1123_v54, %v1111_v37  ;;  %v1409_v23 = vsub.f32 1.0, %v1408_v21  ;;  %v1404_v5 = vor.u32 1.1754944e-38, %v1403_v12  ;;  %v1423_v30 = vmul.f32 %v2694_v44, %v2652_v58 }
 0x57a   :  { %vm1402_vm5 = vcmp.eq.f32.partialorder %v1401_v18, 8.507059e+37  ;;  %vm1413_vm6 = vweird.f32 %v2689_v28  ;;  %vm1412_vm7 = vweird.f32 %v2650_v51  ;;  %v1433_v10 = vand.u32 2147483648, %v2652_v58 }
 0x57b   :  { %v1410_v39 = vmul.f32 %v2689_v28, %v1409_v23  ;;  %v1405_v29 = vsel %vm1402_vm5, %v1404_v5, %v1400_v57  ;;  %v1424_v16 = vsub.f32 1.0, %v1423_v30  ;;  %vm1427_vm8 = vweird.f32 %v2652_v58  ;;  %vm1414_vm9 = vmor %vm1412_vm7, %vm1413_vm6 }
 0x57c   :  { %vm1428_vm3 = vweird.f32 %v2694_v44  ;;  %v1438_v15 = vmul.f32 %v2698_v6, %v2655_v0  ;;  %vm1417_vm10 = vcmp.eq.f32.partialorder %v1416_v8, 8.507059e+37  ;;  %v1419_v4 = vor.u32 1.1754944e-38, %v1418_v61 }
 0x57d   :  { %v1411_v43 = vadd.f32 %v2689_v28, %v1410_v39  ;;  %v1425_v24 = vmul.f32 %v2694_v44, %v1424_v16  ;;  %v1431_v25 = vand.u32 2147483647, %v2652_v58  ;;  %v1434_v56 = vor.u32 1.1754944e-38, %v1433_v10  ;;  %vm1429_vm12 = vmor %vm1427_vm8, %vm1428_vm3 }
 0x57e   :  { %v1439_v27 = vsub.f32 1.0, %v1438_v15  ;;  %v1452_v55 = vadd.f32 %v1405_v29, %v2242_v41  ;;  %vm1443_vm11 = vweird.f32 %v2698_v6  ;;  %v1448_v48 = vand.u32 2147483648, %v2655_v0 }
 0x57f   :  { %v1415_v51 = vsel %vm1414_vm9, %v2689_v28, %v1411_v43  ;;  %v1426_v42 = vadd.f32 %v2694_v44, %v1425_v24  ;;  %v1446_v28 = vand.u32 2147483647, %v2655_v0  ;;  %vm1432_vm13 = vcmp.eq.f32.partialorder %v1431_v25, 8.507059e+37 }
 0x580   :  { %v1420_v45 = vsel %vm1417_vm10, %v1419_v4, %v1415_v51  ;;  %v1440_v26 = vmul.f32 %v2698_v6, %v1439_v27  ;;  %v1460_v41 = vperm.slane %v1452_v55, 0  ;;  %vm1442_vm14 = vweird.f32 %v2655_v0 }
 0x581   :  { %v1453_v49 = vadd.f32 %v1420_v45, %v2246_v32  ;;  %v1430_v63 = vsel %vm1429_vm12, %v2694_v44, %v1426_v42  ;;  %v1476_v13 = vperm.slane %v1452_v55, 1  ;;  %vm1444_vm15 = vmor %vm1442_vm14, %vm1443_vm11  ;;  %v1449_v58 = vor.u32 1.1754944e-38, %v1448_v48  ;;  %v1474_v32 = vpop.permute.xlu2 %1473 }
 0x582   :  { %v1435_v20 = vsel %vm1432_vm13, %v1434_v56, %v1430_v63  ;;  %v1441_v22 = vadd.f32 %v2698_v6, %v1440_v26  ;;  %v1464_v7 = vmul.f32 %v1460_v41, %v1458_v36  ;;  %vm1447_vm0 = vcmp.eq.f32.partialorder %v1446_v28, 8.507059e+37 }
 0x583   :  { %v1461_v59 = vperm.slane %v1453_v49, 0  ;;  %v1454_v11 = vadd.f32 %v1435_v20, %v2248_v2  ;;  %v1477_v19 = vperm.slane %v1453_v49, 1  ;;  %v1480_v40 = vmul.f32 %v1476_v13, %v1474_v32 }
 0x584   :  { %v1445_v52 = vsel %vm1444_vm15, %v2698_v6, %v1441_v22  ;;  %v1468_v60 = vadd.f32 %v1464_v7, %v1124_v9  ;;  %vm1498_vm2 = vcmask 1043456  }
 0x585   :  { %v1465_v44 = vmul.f32 %v1461_v59, %v1458_v36  ;;  %v1450_v0 = vsel %vm1447_vm0, %v1449_v58, %v1445_v52  ;;  %v1462_v53 = vperm.slane %v1454_v11, 0  ;;  %v1481_v34 = vmul.f32 %v1477_v19, %v1474_v32 }
 0x586   :  { %v1455_v62 = vadd.f32 %v1450_v0, %v2254_v1  ;;  %v1478_v17 = vperm.slane %v1454_v11, 1  ;;  %v1484_v33 = vadd.f32 %v1480_v40, %v1468_v60 }
 0x587   :  { %v1469_v31 = vadd.f32 %v1465_v44, %v1125_v46  ;;  %v1466_v50 = vmul.f32 %v1462_v53, %v1458_v36 }
 0x588   :  { %v1463_v38 = vperm.slane %v1455_v62, 0  ;;  %v1479_v35 = vperm.slane %v1455_v62, 1  ;;  %v1482_v18 = vmul.f32 %v1478_v17, %v1474_v32  ;;  %v1488_v12 = vmax.f32 %v1484_v33, 0.0 }
 0x589   :  { %v1485_v2 = vadd.f32 %v1481_v34, %v1469_v31  ;;  %v1470_v3 = vadd.f32 %v1466_v50, %v2711_v14 }
 0x58a   :  { %v1467_v54 = vmul.f32 %v1463_v38, %v1458_v36  ;;  %v1483_v37 = vmul.f32 %v1479_v35, %v1474_v32 }
 0x58b   :  { %v1489_v6 = vmax.f32 %v1485_v2, 0.0  ;;  %v1486_v46 = vadd.f32 %v1482_v18, %v1470_v3 }
 0x58c   :  { %v1471_v9 = vadd.f32 %v1467_v54, %v2713_v47 }
 0x58d   :  { %v1496_v1 = vrot.slane %v1489_v6, 4  ;;  %v1490_v14 = vmax.f32 %v1486_v46, 0.0 }
 0x58e   :  { %v1487_v21 = vadd.f32 %v1483_v37, %v1471_v9 }
 0x58f   :  { %v1499_v57 = vsel %vm1498_vm2, %v1488_v12, %v1496_v1 }
 0x590   :  { %1503 = vst [vmem:[#allocation5] sm:$0xff] %v1499_v57  ;;  %v1491_v23 = vmax.f32 %v1487_v21, 0.0 }
 0x592   :  { %v1497_v5 = vrot.slane %v1491_v23, 4 }
 0x594   :  { %v1500_v47 = vsel %vm1498_vm2, %v1490_v14, %v1497_v5 }
 0x595   :  { %1504 = vst [vmem:[#allocation5 + $0x8] sm:$0xff] %v1500_v47 }
 0x596   :  { %1515 = dma.vmem_to_hbm [thread:$0]  %s1511_s7, 256, %s1513_s30, [#allocation4]  }
 0x597   :  { %1755 = dma.done.wait [#allocation4], 256  }
 0x598   :  { %1756 = vsyncadd [#allocation4], 4294967040 }
 0x599   :  { %1520 = vsyncpa [#allocation3], 1 }
 0x59a   :  { %1521 = vsyncpa [#allocation4], 1 }

</bundles_post_ra>
